<compile_context>
chip_gen: v5e
topology: v5e:2x2
jax: 0.10.0
libtpu: 0.0.40
codegen_flags: <defaults>
</compile_context>

<pallas_src>
import functools

import jax
import jax.numpy as jnp
from jax.experimental import pallas as pl
from jax.experimental.pallas import tpu as pltpu

LN_EPS = 1e-5  # torch.nn.LayerNorm default


# ------------------------------------------------------------------ helpers --

def _ln_f32(x, gamma, beta):
    """LayerNorm over the last dim, computed in f32."""
    xf = x.astype(jnp.float32)
    mean = jnp.mean(xf, axis=-1, keepdims=True)
    var = jnp.mean(jnp.square(xf - mean), axis=-1, keepdims=True)
    y = (xf - mean) * jax.lax.rsqrt(var + LN_EPS)
    return y * gamma.astype(jnp.float32) + beta.astype(jnp.float32)


def _vmem_capacity_bytes():
    try:
        return int(pltpu.get_tpu_info().vmem_capacity_bytes)
    except Exception:
        return 64 * 1024 * 1024  # conservative (v7x-sized) fallback


def _tile_targets(vmem_cap):
    """Generation-aware tile targets: bigger on 128 MiB parts, capped on 64 MiB."""
    big = vmem_cap >= (96 << 20)
    return dict(tm=2048 if big else 1024,   # row (sublane) tile for matmuls
                tn=1024 if big else 512,    # output-column tile
                tf=2048 if big else 1024,   # FFN hidden (reduction) tile
                tq=1024 if big else 512,    # attention query tile
                tk=1024 if big else 512)    # attention key tile


def _cp(sem, vmem_cap):
    """CompilerParams with an explicit, generation-aware VMEM limit."""
    limit = min(int(vmem_cap * 0.85), 100 * 1024 * 1024)
    return pltpu.CompilerParams(dimension_semantics=sem,
                                vmem_limit_bytes=limit)


def _row_tile(m, target):
    """Row tile: full dim when small, else the target (multiple of 8).
    Ragged tails are handled by cdiv grids + masked partial tiles."""
    if m <= target:
        return m
    return max(8, (target // 8) * 8)


def _col_tile(n, target):
    """Lane tile: full dim when small, else prefer an exact divisor (multiple
    of 128), else the target (ragged tail handled by masking)."""
    if n <= target:
        return n
    for t in range(target, 127, -128):
        if n % t == 0:
            return t
    return max(128, (target // 128) * 128)


# ------------------------------------------------------------------ kernels --

def _ln_qkv_kernel(x_ref, g_ref, b_ref, w_ref, wb_ref, o_ref):
    # fused: LayerNorm(x) @ W_qkv + b_qkv   (one N-tile of the 3D-wide output)
    h = _ln_f32(x_ref[...], g_ref[...], b_ref[...]).astype(x_ref.dtype)
    acc = jnp.dot(h, w_ref[...], preferred_element_type=jnp.float32)
    o_ref[...] = (acc + wb_ref[...].astype(jnp.float32)).astype(o_ref.dtype)


def _flash_attn_kernel(q_ref, kv_ref, m_ref, o_ref, m_sc, l_sc, acc_sc, *,
                       num_heads, d_model, scale, seq_len, k_tile):
    # Flash-style online softmax over key tiles (grid axis 2, "arbitrary").
    # All heads handled from lane-dense [tq, 3D]/[tk, 3D] blocks; head
    # split is static column slicing, per-head state lives in scratch columns.
    ki = pl.program_id(2)
    dh = d_model // num_heads

    @pl.when(ki == 0)
    def _():
        m_sc[...] = jnp.full_like(m_sc, -jnp.inf)
        l_sc[...] = jnp.zeros_like(l_sc)
        acc_sc[...] = jnp.zeros_like(acc_sc)

    keep_q = m_ref[...] > 0.0                         # [tq, 1], hoisted
    ragged_keys = (seq_len % k_tile) != 0
    if ragged_keys:
        key_pos = ki * k_tile + jax.lax.broadcasted_iota(
            jnp.int32, (1, k_tile), 1)
        key_valid = key_pos < seq_len                 # [1, tk]

    q = q_ref[...]
    kv = kv_ref[...]
    for h in range(num_heads):                        # small H: unrolled
        qh = q[:, h * dh:(h + 1) * dh] * scale        # scale Q, not [tq,tk]
        kh = kv[:, d_model + h * dh: d_model + (h + 1) * dh]
        vh = kv[:, 2 * d_model + h * dh: 2 * d_model + (h + 1) * dh]
        # QK^T via dot_general contracting last dims (no transpose).
        s = jax.lax.dot_general(qh, kh, (((1,), (1,)), ((), ())),
                                preferred_element_type=jnp.float32)
        # Query-axis mask: masked query rows -> uniform attention (matches
        # softmax(where(m>0, s, -1e9)) of the reference).
        s = jnp.where(keep_q, s, 0.0)
        if ragged_keys:
            s = jnp.where(key_valid, s, -1e30)        # drop OOB tail keys

        m_prev = m_sc[:, h:h + 1]
        m_new = jnp.maximum(m_prev, jnp.max(s, axis=-1, keepdims=True))
        alpha = jnp.exp(m_prev - m_new)
        p = jnp.exp(s - m_new)
        l_sc[:, h:h + 1] = alpha * l_sc[:, h:h + 1] + jnp.sum(
            p, axis=-1, keepdims=True)
        acc_sc[:, h * dh:(h + 1) * dh] = (
            alpha * acc_sc[:, h * dh:(h + 1) * dh]
            + jnp.dot(p.astype(vh.dtype), vh,
                      preferred_element_type=jnp.float32))
        m_sc[:, h:h + 1] = m_new

    @pl.when(ki == pl.num_programs(2) - 1)
    def _():
        inv_l = pl.reciprocal(l_sc[...], approx=False)     # exact
        cols = [acc_sc[:, h * dh:(h + 1) * dh] * inv_l[:, h:h + 1]
                for h in range(num_heads)]
        o_ref[...] = jnp.concatenate(cols, axis=-1).astype(o_ref.dtype)


def _proj_residual_kernel(a_ref, w_ref, b_ref, r_ref, o_ref):
    # fused: residual + (attn @ Wo + bo)   (dropout == identity at inference)
    acc = jnp.dot(a_ref[...], w_ref[...], preferred_element_type=jnp.float32)
    acc = acc + b_ref[...].astype(jnp.float32) + r_ref[...].astype(jnp.float32)
    o_ref[...] = acc.astype(o_ref.dtype)


def _ln_ffn_residual_kernel(x_ref, g_ref, b_ref, w1_ref, b1_ref, w2_ref, b2_ref,
                            o_ref, acc_ref, h_ref, *, f_total, f_tile):
    # fused: x + ReLU(LN2(x) @ W1 + b1) @ W2 + b2, reduced over the FFN hidden
    # axis (grid axis 1, "arbitrary") with a f32 VMEM accumulator.
    f = pl.program_id(1)

    @pl.when(f == 0)
    def _():
        acc_ref[...] = jnp.zeros_like(acc_ref)
        # LN2(x) computed once per row tile and cached (reused for every f).
        h_ref[...] = _ln_f32(x_ref[...], g_ref[...], b_ref[...]).astype(
            h_ref.dtype)

    t = jnp.dot(h_ref[...], w1_ref[...], preferred_element_type=jnp.float32)
    t = jnp.maximum(t + b1_ref[...].astype(jnp.float32), 0.0)
    if (f_total % f_tile) != 0:
        # Zero the ragged hidden tail so OOB w1/w2 tiles cannot pollute the sum.
        hid_pos = f * f_tile + jax.lax.broadcasted_iota(
            jnp.int32, (1, f_tile), 1)
        t = jnp.where(hid_pos < f_total, t, 0.0)
    acc_ref[...] += jnp.dot(t.astype(w2_ref.dtype), w2_ref[...],
                            preferred_element_type=jnp.float32)

    @pl.when(f == pl.num_programs(1) - 1)
    def _():
        o_ref[...] = (acc_ref[...] + b2_ref[...].astype(jnp.float32)
                      + x_ref[...].astype(jnp.float32)).astype(o_ref.dtype)


# ----------------------------------------------------------------- wrappers --

def ln_qkv(x2d, gamma, beta, wqkv, bqkv, *, tm, tn, vmem_cap):
    M, D = x2d.shape
    N = wqkv.shape[1]
    return pl.pallas_call(
        _ln_qkv_kernel,
        out_shape=jax.ShapeDtypeStruct((M, N), x2d.dtype),
        grid=(pl.cdiv(M, tm), pl.cdiv(N, tn)),
        in_specs=[
            pl.BlockSpec((tm, D), lambda i, n: (i, 0)),
            pl.BlockSpec((1, D), lambda i, n: (0, 0)),
            pl.BlockSpec((1, D), lambda i, n: (0, 0)),
            pl.BlockSpec((D, tn), lambda i, n: (0, n)),
            pl.BlockSpec((1, tn), lambda i, n: (0, n)),
        ],
        out_specs=pl.BlockSpec((tm, tn), lambda i, n: (i, n)),
        compiler_params=_cp(("parallel", "parallel"), vmem_cap),
    )(x2d, gamma.reshape(1, D), beta.reshape(1, D), wqkv, bqkv.reshape(1, N))


def flash_attention(qkv2d, mask2d, *, batch, seq, num_heads, d_model,
                    tq, tk, vmem_cap):
    scale = 1.0 / float(d_model // num_heads) ** 0.5
    qkv3 = qkv2d.reshape(batch, seq, 3 * d_model)
    mask3 = mask2d.reshape(batch, seq, 1)
    out = pl.pallas_call(
        functools.partial(_flash_attn_kernel, num_heads=num_heads,
                          d_model=d_model, scale=scale, seq_len=seq,
                          k_tile=tk),
        out_shape=jax.ShapeDtypeStruct((batch, seq, d_model), qkv2d.dtype),
        grid=(batch, pl.cdiv(seq, tq), pl.cdiv(seq, tk)),
        in_specs=[
            pl.BlockSpec((None, tq, 3 * d_model), lambda b, qi, ki: (b, qi, 0)),
            pl.BlockSpec((None, tk, 3 * d_model), lambda b, qi, ki: (b, ki, 0)),
            pl.BlockSpec((None, tq, 1), lambda b, qi, ki: (b, qi, 0)),
        ],
        out_specs=pl.BlockSpec((None, tq, d_model), lambda b, qi, ki: (b, qi, 0)),
        scratch_shapes=[pltpu.VMEM((tq, num_heads), jnp.float32),
                        pltpu.VMEM((tq, num_heads), jnp.float32),
                        pltpu.VMEM((tq, d_model), jnp.float32)],
        compiler_params=_cp(("parallel", "parallel", "arbitrary"), vmem_cap),
    )(qkv3, qkv3, mask3)
    return out.reshape(batch * seq, d_model)


def proj_residual(a2d, w, b, r2d, *, tm, tn, vmem_cap):
    M, K = a2d.shape
    N = w.shape[1]
    return pl.pallas_call(
        _proj_residual_kernel,
        out_shape=jax.ShapeDtypeStruct((M, N), r2d.dtype),
        grid=(pl.cdiv(M, tm), pl.cdiv(N, tn)),
        in_specs=[
            pl.BlockSpec((tm, K), lambda i, n: (i, 0)),
            pl.BlockSpec((K, tn), lambda i, n: (0, n)),
            pl.BlockSpec((1, tn), lambda i, n: (0, n)),
            pl.BlockSpec((tm, tn), lambda i, n: (i, n)),
        ],
        out_specs=pl.BlockSpec((tm, tn), lambda i, n: (i, n)),
        compiler_params=_cp(("parallel", "parallel"), vmem_cap),
    )(a2d, w, b.reshape(1, N), r2d)


def ln_ffn_residual(x2d, gamma, beta, w1, b1, w2, b2, *, tm, tf, vmem_cap):
    M, D = x2d.shape
    F = w1.shape[1]
    return pl.pallas_call(
        functools.partial(_ln_ffn_residual_kernel, f_total=F, f_tile=tf),
        out_shape=jax.ShapeDtypeStruct((M, D), x2d.dtype),
        grid=(pl.cdiv(M, tm), pl.cdiv(F, tf)),
        in_specs=[
            pl.BlockSpec((tm, D), lambda i, f: (i, 0)),
            pl.BlockSpec((1, D), lambda i, f: (0, 0)),
            pl.BlockSpec((1, D), lambda i, f: (0, 0)),
            pl.BlockSpec((D, tf), lambda i, f: (0, f)),
            pl.BlockSpec((1, tf), lambda i, f: (0, f)),
            pl.BlockSpec((tf, D), lambda i, f: (f, 0)),
            pl.BlockSpec((1, D), lambda i, f: (0, 0)),
        ],
        out_specs=pl.BlockSpec((tm, D), lambda i, f: (i, 0)),
        scratch_shapes=[pltpu.VMEM((tm, D), jnp.float32),   # acc
                        pltpu.VMEM((tm, D), x2d.dtype)],    # cached LN2(x)
        compiler_params=_cp(("parallel", "arbitrary"), vmem_cap),
    )(x2d, gamma.reshape(1, D), beta.reshape(1, D),
      w1, b1.reshape(1, F), w2, b2.reshape(1, D))


def prepare_params(params):
    """Pre-fuse QKV weights/biases ONCE at parameter-build time (not per call)."""
    p = dict(params)
    p["wqkv"] = jnp.concatenate([params["wq"], params["wk"], params["wv"]], 1)
    p["bqkv"] = jnp.concatenate([params["bq"], params["bk"], params["bv"]], 0)
    return p


def encoder_layer(x, mask, params, *, num_heads):
    """Pallas implementation of EncoderLayer.forward (inference).

    x:    [B, S, D] sequences
    mask: [B, S]    float (1 keep / 0 masked, query-axis semantics)
    returns (sequences, mask) mirroring SingleForwardState.
    """
    B, S, D = x.shape
    M = B * S
    F = params["w1"].shape[1]
    x2d = x.reshape(M, D)
    mask2d = mask.reshape(M, 1).astype(jnp.float32)

    if "wqkv" in params:                     # pre-fused (preferred)
        wqkv, bqkv = params["wqkv"], params["bqkv"]
    else:                                    # fallback: fuse in-graph
        wqkv = jnp.concatenate([params["wq"], params["wk"], params["wv"]], 1)
        bqkv = jnp.concatenate([params["bq"], params["bk"], params["bv"]], 0)

    vmem_cap = _vmem_capacity_bytes()
    tt = _tile_targets(vmem_cap)
    tm = _row_tile(M, tt["tm"])
    tq = _row_tile(S, tt["tq"])
    tk = _row_tile(S, tt["tk"])

    # ---- sub-layer "attention": x + Wo(attn(LN1(x))) + bo -------------------
    qkv = ln_qkv(x2d, params["ln1_g"], params["ln1_b"], wqkv, bqkv,
                 tm=tm, tn=_col_tile(3 * D, tt["tn"]), vmem_cap=vmem_cap)
    attn = flash_attention(qkv, mask2d, batch=B, seq=S, num_heads=num_heads,
                           d_model=D, tq=tq, tk=tk, vmem_cap=vmem_cap)
    context = proj_residual(attn, params["wo"], params["bo"], x2d,
                            tm=tm, tn=_col_tile(D, tt["tn"]), vmem_cap=vmem_cap)

    # ---- sub-layer "feed_forward": ctx + W2(ReLU(W1(LN2(ctx)))) --------------
    out2d = ln_ffn_residual(context, params["ln2_g"], params["ln2_b"],
                            params["w1"], params["b1"],
                            params["w2"], params["b2"],
                            tm=tm, tf=_col_tile(F, tt["tf"]), vmem_cap=vmem_cap)

    return out2d.reshape(B, S, D), mask


# ---------------------------------------------------------------- reference --

def reference_encoder_layer(x, mask, p, *, num_heads):
    def ln(t, g, b):
        mu = t.mean(-1, keepdims=True)
        var = ((t - mu) ** 2).mean(-1, keepdims=True)
        return (t - mu) / jnp.sqrt(var + LN_EPS) * g + b

    B, S, D = x.shape
    Dh = D // num_heads
    h = ln(x, p["ln1_g"], p["ln1_b"])
    q = h @ p["wq"] + p["bq"]
    k = h @ p["wk"] + p["bk"]
    v = h @ p["wv"] + p["bv"]

    def split(t):
        return t.reshape(B, S, num_heads, Dh).transpose(0, 2, 1, 3)

    q, k, v = split(q), split(k), split(v)
    s = jnp.einsum("bhqd,bhkd->bhqk", q, k) / jnp.sqrt(jnp.float32(Dh))
    m = mask[:, None, :, None]                    # [B,1,S,1] query-axis mask
    s = jnp.where(m > 0, s, -1e9)
    a = jax.nn.softmax(s, axis=-1)
    o = jnp.einsum("bhqk,bhkd->bhqd", a, v).transpose(0, 2, 1, 3).reshape(B, S, D)
    ctx = x + (o @ p["wo"] + p["bo"])
    h2 = ln(ctx, p["ln2_g"], p["ln2_b"])
    ff = jnp.maximum(h2 @ p["w1"] + p["b1"], 0.0) @ p["w2"] + p["b2"]
    return ctx + ff


# -------------------------------------------------------------------- main ---

def init_params(key, d_model, d_ff):
    keys = jax.random.split(key, 6)
    s = 0.02
    return {
        "ln1_g": jnp.ones((d_model,), jnp.float32),
        "ln1_b": jnp.zeros((d_model,), jnp.float32),
        "ln2_g": jnp.ones((d_model,), jnp.float32),
        "ln2_b": jnp.zeros((d_model,), jnp.float32),
        "wq": s * jax.random.normal(keys[0], (d_model, d_model), jnp.float32),
        "bq": jnp.zeros((d_model,), jnp.float32),
        "wk": s * jax.random.normal(keys[1], (d_model, d_model), jnp.float32),
        "bk": jnp.zeros((d_model,), jnp.float32),
        "wv": s * jax.random.normal(keys[2], (d_model, d_model), jnp.float32),
        "bv": jnp.zeros((d_model,), jnp.float32),
        "wo": s * jax.random.normal(keys[3], (d_model, d_model), jnp.float32),
        "bo": jnp.zeros((d_model,), jnp.float32),
        "w1": s * jax.random.normal(keys[4], (d_model, d_ff), jnp.float32),
        "b1": jnp.zeros((d_ff,), jnp.float32),
        "w2": s * jax.random.normal(keys[5], (d_ff, d_model), jnp.float32),
        "b2": jnp.zeros((d_model,), jnp.float32),
    }


if __name__ == "__main__":
    B, S, D, H, D_FF = 2, 8, 32, 4, 64

    key = jax.random.PRNGKey(0)
    k_x, k_p = jax.random.split(key)
    x = jax.random.normal(k_x, (B, S, D), jnp.float32)
    lengths = jnp.array([S, 5], jnp.int32)
    mask = (jnp.arange(S)[None, :] < lengths[:, None]).astype(jnp.float32)  # [B, S]
    params = prepare_params(init_params(k_p, D, D_FF))   # QKV fusion hoisted

    out, out_mask = jax.jit(
        functools.partial(encoder_layer, num_heads=H)
    )(x, mask, params)
    out = jax.block_until_ready(out)

    ref = reference_encoder_layer(x, mask, params, num_heads=H)
    assert out.shape == (B, S, D) and out_mask.shape == (B, S)
    assert jnp.allclose(out, ref, atol=2e-3, rtol=2e-3), float(
        jnp.max(jnp.abs(out - ref)))

    print("KERNEL_OK")
</pallas_src>

<mosaic_0001>
module attributes {stable_mosaic.version = 11 : i64} {
  func.func @_proj_residual_kernel(%arg0: i32, %arg1: i32, %arg2: memref<16x32xf32, #tpu.memory_space<vmem>>, %arg3: memref<32x32xf32, #tpu.memory_space<vmem>>, %arg4: memref<1x32xf32, #tpu.memory_space<vmem>>, %arg5: memref<16x32xf32, #tpu.memory_space<vmem>>, %arg6: memref<16x32xf32, #tpu.memory_space<vmem>>) attributes {dimension_semantics = [#tpu.dimension_semantics<parallel>, #tpu.dimension_semantics<parallel>], iteration_bounds = array<i64: 1, 1>, scalar_prefetch = 0 : i64, scratch_operands = 0 : i64, tpu.core_type = #tpu.core_type<tc>, window_params = [{transform_indices = @transform_0, window_bounds = array<i64: 16, 32>}, {transform_indices = @transform_1, window_bounds = array<i64: 32, 32>}, {transform_indices = @transform_2, window_bounds = array<i64: 1, 32>}, {transform_indices = @transform_3, window_bounds = array<i64: 16, 32>}, {transform_indices = @transform_4, window_bounds = array<i64: 16, 32>}]} {
    %c0 = arith.constant 0 : index
    %c0_0 = arith.constant 0 : index
    %0 = vector.load %arg2[%c0, %c0_0] : memref<16x32xf32, #tpu.memory_space<vmem>>, vector<16x32xf32>
    %c0_1 = arith.constant 0 : index
    %c0_2 = arith.constant 0 : index
    %1 = vector.load %arg3[%c0_1, %c0_2] : memref<32x32xf32, #tpu.memory_space<vmem>>, vector<32x32xf32>
    %cst = arith.constant dense<0.000000e+00> : vector<16x32xf32>
    %2 = tpu.matmul %0, %1, %cst {dimension_numbers = #tpu.dot_dimension_numbers<[1], [0], [0], [1], [0, 0, 1, 1], [], []>} : vector<16x32xf32>, vector<32x32xf32>, vector<16x32xf32> -> vector<16x32xf32>
    %c0_3 = arith.constant 0 : index
    %c0_4 = arith.constant 0 : index
    %3 = vector.load %arg4[%c0_3, %c0_4] : memref<1x32xf32, #tpu.memory_space<vmem>>, vector<1x32xf32>
    %4 = vector.broadcast %3 : vector<1x32xf32> to vector<16x32xf32>
    %5 = arith.addf %2, %4 : vector<16x32xf32>
    %c0_5 = arith.constant 0 : index
    %c0_6 = arith.constant 0 : index
    %6 = vector.load %arg5[%c0_5, %c0_6] : memref<16x32xf32, #tpu.memory_space<vmem>>, vector<16x32xf32>
    %7 = arith.addf %5, %6 : vector<16x32xf32>
    %c0_7 = arith.constant 0 : index
    %c0_8 = arith.constant 0 : index
    %8 = vector.load %arg6[%c0_7, %c0_8] : memref<16x32xf32, #tpu.memory_space<vmem>>, vector<16x32xf32>
    tpu.vector_store %arg6[%c0_7, %c0_8], %7 {strides = array<i32>} : memref<16x32xf32, #tpu.memory_space<vmem>>, vector<16x32xf32>,
    return
  }
  func.func @transform_0(%arg0: i32, %arg1: i32) -> (i32, i32) {
    %c0_i32 = arith.constant 0 : i32
    %c0_i32_0 = arith.constant 0 : i32
    return %arg0, %c0_i32 : i32, i32
  }
  func.func @transform_1(%arg0: i32, %arg1: i32) -> (i32, i32) {
    %c0_i32 = arith.constant 0 : i32
    %c0_i32_0 = arith.constant 0 : i32
    return %c0_i32, %arg1 : i32, i32
  }
  func.func @transform_2(%arg0: i32, %arg1: i32) -> (i32, i32) {
    %c0_i32 = arith.constant 0 : i32
    %c0_i32_0 = arith.constant 0 : i32
    return %c0_i32, %arg1 : i32, i32
  }
  func.func @transform_3(%arg0: i32, %arg1: i32) -> (i32, i32) {
    %c0_i32 = arith.constant 0 : i32
    return %arg0, %arg1 : i32, i32
  }
  func.func @transform_4(%arg0: i32, %arg1: i32) -> (i32, i32) {
    %c0_i32 = arith.constant 0 : i32
    return %arg0, %arg1 : i32, i32
  }
}

module attributes {stable_mosaic.version = 11 : i64} {
  func.func @_ln_qkv_kernel(%arg0: i32, %arg1: i32, %arg2: memref<16x32xf32, #tpu.memory_space<vmem>>, %arg3: memref<1x32xf32, #tpu.memory_space<vmem>>, %arg4: memref<1x32xf32, #tpu.memory_space<vmem>>, %arg5: memref<32x96xf32, #tpu.memory_space<vmem>>, %arg6: memref<1x96xf32, #tpu.memory_space<vmem>>, %arg7: memref<16x96xf32, #tpu.memory_space<vmem>>) attributes {dimension_semantics = [#tpu.dimension_semantics<parallel>, #tpu.dimension_semantics<parallel>], iteration_bounds = array<i64: 1, 1>, scalar_prefetch = 0 : i64, scratch_operands = 0 : i64, tpu.core_type = #tpu.core_type<tc>, window_params = [{transform_indices = @transform_0, window_bounds = array<i64: 16, 32>}, {pipeline_mode = #tpu.pipeline_mode<synchronous>, transform_indices = @transform_1, window_bounds = array<i64: 1, 32>}, {pipeline_mode = #tpu.pipeline_mode<synchronous>, transform_indices = @transform_2, window_bounds = array<i64: 1, 32>}, {transform_indices = @transform_3, window_bounds = array<i64: 32, 96>}, {transform_indices = @transform_4, window_bounds = array<i64: 1, 96>}, {transform_indices = @transform_5, window_bounds = array<i64: 16, 96>}]} {
    %c0 = arith.constant 0 : index
    %c0_0 = arith.constant 0 : index
    %0 = vector.load %arg2[%c0, %c0_0] : memref<16x32xf32, #tpu.memory_space<vmem>>, vector<16x32xf32>
    %c0_1 = arith.constant 0 : index
    %c0_2 = arith.constant 0 : index
    %1 = vector.load %arg3[%c0_1, %c0_2] : memref<1x32xf32, #tpu.memory_space<vmem>>, vector<1x32xf32>
    %c0_3 = arith.constant 0 : index
    %c0_4 = arith.constant 0 : index
    %2 = vector.load %arg4[%c0_3, %c0_4] : memref<1x32xf32, #tpu.memory_space<vmem>>, vector<1x32xf32>
    %cst = arith.constant dense<0.000000e+00> : vector<16xf32>
    %3 = vector.multi_reduction <add>, %0, %cst [1] : vector<16x32xf32> to vector<16xf32>
    %4 = vector.shape_cast %3 : vector<16xf32> to vector<16x1xf32>
    %cst_5 = arith.constant 3.200000e+01 : f32
    %5 = vector.broadcast %cst_5 : f32 to vector<16x1xf32>
    %6 = arith.divf %4, %5 : vector<16x1xf32>
    %7 = vector.broadcast %6 : vector<16x1xf32> to vector<16x32xf32>
    %8 = arith.subf %0, %7 : vector<16x32xf32>
    %9 = arith.mulf %8, %8 : vector<16x32xf32>
    %cst_6 = arith.constant dense<0.000000e+00> : vector<16xf32>
    %10 = vector.multi_reduction <add>, %9, %cst_6 [1] : vector<16x32xf32> to vector<16xf32>
    %11 = vector.shape_cast %10 : vector<16xf32> to vector<16x1xf32>
    %cst_7 = arith.constant 3.200000e+01 : f32
    %12 = vector.broadcast %cst_7 : f32 to vector<16x1xf32>
    %13 = arith.divf %11, %12 : vector<16x1xf32>
    %14 = vector.broadcast %6 : vector<16x1xf32> to vector<16x32xf32>
    %15 = arith.subf %0, %14 : vector<16x32xf32>
    %cst_8 = arith.constant 9.99999974E-6 : f32
    %16 = vector.broadcast %cst_8 : f32 to vector<16x1xf32>
    %17 = arith.addf %13, %16 : vector<16x1xf32>
    %18 = math.rsqrt %17 : vector<16x1xf32>
    %19 = vector.broadcast %18 : vector<16x1xf32> to vector<16x32xf32>
    %20 = arith.mulf %15, %19 : vector<16x32xf32>
    %21 = vector.broadcast %1 : vector<1x32xf32> to vector<16x32xf32>
    %22 = arith.mulf %20, %21 : vector<16x32xf32>
    %23 = vector.broadcast %2 : vector<1x32xf32> to vector<16x32xf32>
    %24 = arith.addf %22, %23 : vector<16x32xf32>
    %c0_9 = arith.constant 0 : index
    %c0_10 = arith.constant 0 : index
    %25 = vector.load %arg5[%c0_9, %c0_10] : memref<32x96xf32, #tpu.memory_space<vmem>>, vector<32x96xf32>
    %cst_11 = arith.constant dense<0.000000e+00> : vector<16x96xf32>
    %26 = tpu.matmul %24, %25, %cst_11 {dimension_numbers = #tpu.dot_dimension_numbers<[1], [0], [0], [1], [0, 0, 1, 1], [], []>} : vector<16x32xf32>, vector<32x96xf32>, vector<16x96xf32> -> vector<16x96xf32>
    %c0_12 = arith.constant 0 : index
    %c0_13 = arith.constant 0 : index
    %27 = vector.load %arg6[%c0_12, %c0_13] : memref<1x96xf32, #tpu.memory_space<vmem>>, vector<1x96xf32>
    %28 = vector.broadcast %27 : vector<1x96xf32> to vector<16x96xf32>
    %29 = arith.addf %26, %28 : vector<16x96xf32>
    %c0_14 = arith.constant 0 : index
    %c0_15 = arith.constant 0 : index
    %30 = vector.load %arg7[%c0_14, %c0_15] : memref<16x96xf32, #tpu.memory_space<vmem>>, vector<16x96xf32>
    tpu.vector_store %arg7[%c0_14, %c0_15], %29 {strides = array<i32>} : memref<16x96xf32, #tpu.memory_space<vmem>>, vector<16x96xf32>,
    return
  }
  func.func @transform_0(%arg0: i32, %arg1: i32) -> (i32, i32) {
    %c0_i32 = arith.constant 0 : i32
    %c0_i32_0 = arith.constant 0 : i32
    return %arg0, %c0_i32 : i32, i32
  }
  func.func @transform_1(%arg0: i32, %arg1: i32) -> (i32, i32) {
    %c0_i32 = arith.constant 0 : i32
    %c0_i32_0 = arith.constant 0 : i32
    %c0_i32_1 = arith.constant 0 : i32
    return %c0_i32, %c0_i32_0 : i32, i32
  }
  func.func @transform_2(%arg0: i32, %arg1: i32) -> (i32, i32) {
    %c0_i32 = arith.constant 0 : i32
    %c0_i32_0 = arith.constant 0 : i32
    %c0_i32_1 = arith.constant 0 : i32
    return %c0_i32, %c0_i32_0 : i32, i32
  }
  func.func @transform_3(%arg0: i32, %arg1: i32) -> (i32, i32) {
    %c0_i32 = arith.constant 0 : i32
    %c0_i32_0 = arith.constant 0 : i32
    return %c0_i32, %arg1 : i32, i32
  }
  func.func @transform_4(%arg0: i32, %arg1: i32) -> (i32, i32) {
    %c0_i32 = arith.constant 0 : i32
    %c0_i32_0 = arith.constant 0 : i32
    return %c0_i32, %arg1 : i32, i32
  }
  func.func @transform_5(%arg0: i32, %arg1: i32) -> (i32, i32) {
    %c0_i32 = arith.constant 0 : i32
    return %arg0, %arg1 : i32, i32
  }
}

module attributes {stable_mosaic.version = 11 : i64} {
  func.func @_flash_attn_kernel(%arg0: i32, %arg1: i32, %arg2: i32, %arg3: memref<1x8x96xf32, #tpu.memory_space<vmem>>, %arg4: memref<1x8x96xf32, #tpu.memory_space<vmem>>, %arg5: memref<1x8x1xf32, #tpu.memory_space<vmem>>, %arg6: memref<1x8x32xf32, #tpu.memory_space<vmem>>, %arg7: memref<8x4xf32, #tpu.memory_space<vmem>>, %arg8: memref<8x4xf32, #tpu.memory_space<vmem>>, %arg9: memref<8x32xf32, #tpu.memory_space<vmem>>) attributes {dimension_semantics = [#tpu.dimension_semantics<parallel>, #tpu.dimension_semantics<parallel>, #tpu.dimension_semantics<arbitrary>], iteration_bounds = array<i64: 2, 1, 1>, scalar_prefetch = 0 : i64, scratch_operands = 3 : i64, tpu.core_type = #tpu.core_type<tc>, window_params = [{transform_indices = @transform_0, window_bounds = array<i64: 1, 8, 96>}, {transform_indices = @transform_1, window_bounds = array<i64: 1, 8, 96>}, {transform_indices = @transform_2, window_bounds = array<i64: 1, 8, 1>}, {transform_indices = @transform_3, window_bounds = array<i64: 1, 8, 32>}]} {
    %c0_i32 = arith.constant 0 : i32
    %0 = arith.cmpi eq, %arg2, %c0_i32 : i32
    %1 = arith.extui %0 : i1 to i32
    %c0_i32_0 = arith.constant 0 : i32
    %2 = arith.cmpi ne, %1, %c0_i32_0 : i32
    scf.if %2 {
      %cst_77 = arith.constant 0xFF800000 : f32
      %142 = vector.broadcast %cst_77 : f32 to vector<8x4xf32>
      %c0_78 = arith.constant 0 : index
      %c0_79 = arith.constant 0 : index
      %143 = vector.load %arg7[%c0_78, %c0_79] : memref<8x4xf32, #tpu.memory_space<vmem>>, vector<8x4xf32>
      tpu.vector_store %arg7[%c0_78, %c0_79], %142 {strides = array<i32>} : memref<8x4xf32, #tpu.memory_space<vmem>>, vector<8x4xf32>,
      %cst_80 = arith.constant 0.000000e+00 : f32
      %144 = vector.broadcast %cst_80 : f32 to vector<8x4xf32>
      %c0_81 = arith.constant 0 : index
      %c0_82 = arith.constant 0 : index
      %145 = vector.load %arg8[%c0_81, %c0_82] : memref<8x4xf32, #tpu.memory_space<vmem>>, vector<8x4xf32>
      tpu.vector_store %arg8[%c0_81, %c0_82], %144 {strides = array<i32>} : memref<8x4xf32, #tpu.memory_space<vmem>>, vector<8x4xf32>,
      %cst_83 = arith.constant 0.000000e+00 : f32
      %146 = vector.broadcast %cst_83 : f32 to vector<8x32xf32>
      %c0_84 = arith.constant 0 : index
      %c0_85 = arith.constant 0 : index
      %147 = vector.load %arg9[%c0_84, %c0_85] : memref<8x32xf32, #tpu.memory_space<vmem>>, vector<8x32xf32>
      tpu.vector_store %arg9[%c0_84, %c0_85], %146 {strides = array<i32>} : memref<8x32xf32, #tpu.memory_space<vmem>>, vector<8x32xf32>,
    } else {
    }
    %c0 = arith.constant 0 : index
    %c0_1 = arith.constant 0 : index
    %c0_2 = arith.constant 0 : index
    %3 = vector.load %arg5[%c0, %c0_1, %c0_2] : memref<1x8x1xf32, #tpu.memory_space<vmem>>, vector<1x8x1xf32>
    %4 = vector.shape_cast %3 : vector<1x8x1xf32> to vector<8x1xf32>
    %cst = arith.constant 0.000000e+00 : f32
    %5 = vector.broadcast %cst : f32 to vector<8x1xf32>
    %6 = arith.cmpf ogt, %4, %5 : vector<8x1xf32>
    %c0_3 = arith.constant 0 : index
    %c0_4 = arith.constant 0 : index
    %c0_5 = arith.constant 0 : index
    %7 = vector.load %arg3[%c0_3, %c0_4, %c0_5] : memref<1x8x96xf32, #tpu.memory_space<vmem>>, vector<1x8x96xf32>
    %8 = vector.shape_cast %7 : vector<1x8x96xf32> to vector<8x96xf32>
    %c0_6 = arith.constant 0 : index
    %c0_7 = arith.constant 0 : index
    %c0_8 = arith.constant 0 : index
    %9 = vector.load %arg4[%c0_6, %c0_7, %c0_8] : memref<1x8x96xf32, #tpu.memory_space<vmem>>, vector<1x8x96xf32>
    %10 = vector.shape_cast %9 : vector<1x8x96xf32> to vector<8x96xf32>
    %11 = vector.extract_strided_slice %8 {offsets = [0, 0], sizes = [8, 8], strides = [1, 1]} : vector<8x96xf32> to vector<8x8xf32>
    %cst_9 = arith.constant 0.353553385 : f32
    %12 = vector.broadcast %cst_9 : f32 to vector<8x8xf32>
    %13 = arith.mulf %11, %12 : vector<8x8xf32>
    %14 = vector.extract_strided_slice %10 {offsets = [0, 32], sizes = [8, 8], strides = [1, 1]} : vector<8x96xf32> to vector<8x8xf32>
    %15 = vector.extract_strided_slice %10 {offsets = [0, 64], sizes = [8, 8], strides = [1, 1]} : vector<8x96xf32> to vector<8x8xf32>
    %cst_10 = arith.constant dense<0.000000e+00> : vector<8x8xf32>
    %16 = tpu.matmul %13, %14, %cst_10 {dimension_numbers = #tpu.dot_dimension_numbers<[1], [1], [0], [0], [0, 0, 1, 0], [], []>} : vector<8x8xf32>, vector<8x8xf32>, vector<8x8xf32> -> vector<8x8xf32>
    %cst_11 = arith.constant 0.000000e+00 : f32
    %17 = vector.shape_cast %6 : vector<8x1xi1> to vector<8x1xi1>
    %18 = vector.broadcast %17 : vector<8x1xi1> to vector<8x8xi1>
    %19 = vector.broadcast %cst_11 : f32 to vector<8x8xf32>
    %20 = arith.select %18, %16, %19 : vector<8x8xi1>, vector<8x8xf32>
    %c0_12 = arith.constant 0 : index
    %c0_13 = arith.constant 0 : index
    %21 = vector.load %arg7[%c0_12, %c0_13] : memref<8x4xf32, #tpu.memory_space<vmem>>, vector<8x1xf32>
    %cst_14 = arith.constant dense<0xFF800000> : vector<8xf32>
    %22 = vector.multi_reduction <maximumf>, %20, %cst_14 [1] : vector<8x8xf32> to vector<8xf32>
    %23 = vector.shape_cast %22 : vector<8xf32> to vector<8x1xf32>
    %24 = arith.maximumf %21, %23 : vector<8x1xf32>
    %25 = arith.subf %21, %24 : vector<8x1xf32>
    %26 = math.exp %25 : vector<8x1xf32>
    %27 = vector.broadcast %24 : vector<8x1xf32> to vector<8x8xf32>
    %28 = arith.subf %20, %27 : vector<8x8xf32>
    %29 = math.exp %28 : vector<8x8xf32>
    %c0_15 = arith.constant 0 : index
    %c0_16 = arith.constant 0 : index
    %30 = vector.load %arg8[%c0_15, %c0_16] : memref<8x4xf32, #tpu.memory_space<vmem>>, vector<8x1xf32>
    %31 = arith.mulf %26, %30 : vector<8x1xf32>
    %cst_17 = arith.constant dense<0.000000e+00> : vector<8xf32>
    %32 = vector.multi_reduction <add>, %29, %cst_17 [1] : vector<8x8xf32> to vector<8xf32>
    %33 = vector.shape_cast %32 : vector<8xf32> to vector<8x1xf32>
    %34 = arith.addf %31, %33 : vector<8x1xf32>
    %c0_18 = arith.constant 0 : index
    %c0_19 = arith.constant 0 : index
    %35 = vector.load %arg8[%c0_18, %c0_19] : memref<8x4xf32, #tpu.memory_space<vmem>>, vector<8x1xf32>
    tpu.vector_store %arg8[%c0_18, %c0_19], %34 {strides = array<i32>} : memref<8x4xf32, #tpu.memory_space<vmem>>, vector<8x1xf32>,
    %c0_20 = arith.constant 0 : index
    %c0_21 = arith.constant 0 : index
    %36 = vector.load %arg9[%c0_20, %c0_21] : memref<8x32xf32, #tpu.memory_space<vmem>>, vector<8x8xf32>
    %37 = vector.broadcast %26 : vector<8x1xf32> to vector<8x8xf32>
    %38 = arith.mulf %37, %36 : vector<8x8xf32>
    %cst_22 = arith.constant dense<0.000000e+00> : vector<8x8xf32>
    %39 = tpu.matmul %29, %15, %cst_22 {dimension_numbers = #tpu.dot_dimension_numbers<[1], [0], [0], [1], [0, 0, 1, 1], [], []>} : vector<8x8xf32>, vector<8x8xf32>, vector<8x8xf32> -> vector<8x8xf32>
    %40 = arith.addf %38, %39 : vector<8x8xf32>
    %c0_23 = arith.constant 0 : index
    %c0_24 = arith.constant 0 : index
    %41 = vector.load %arg9[%c0_23, %c0_24] : memref<8x32xf32, #tpu.memory_space<vmem>>, vector<8x8xf32>
    tpu.vector_store %arg9[%c0_23, %c0_24], %40 {strides = array<i32>} : memref<8x32xf32, #tpu.memory_space<vmem>>, vector<8x8xf32>,
    %c0_25 = arith.constant 0 : index
    %c0_26 = arith.constant 0 : index
    %42 = vector.load %arg7[%c0_25, %c0_26] : memref<8x4xf32, #tpu.memory_space<vmem>>, vector<8x1xf32>
    tpu.vector_store %arg7[%c0_25, %c0_26], %24 {strides = array<i32>} : memref<8x4xf32, #tpu.memory_space<vmem>>, vector<8x1xf32>,
    %43 = vector.extract_strided_slice %8 {offsets = [0, 8], sizes = [8, 8], strides = [1, 1]} : vector<8x96xf32> to vector<8x8xf32>
    %cst_27 = arith.constant 0.353553385 : f32
    %44 = vector.broadcast %cst_27 : f32 to vector<8x8xf32>
    %45 = arith.mulf %43, %44 : vector<8x8xf32>
    %46 = vector.extract_strided_slice %10 {offsets = [0, 40], sizes = [8, 8], strides = [1, 1]} : vector<8x96xf32> to vector<8x8xf32>
    %47 = vector.extract_strided_slice %10 {offsets = [0, 72], sizes = [8, 8], strides = [1, 1]} : vector<8x96xf32> to vector<8x8xf32>
    %cst_28 = arith.constant dense<0.000000e+00> : vector<8x8xf32>
    %48 = tpu.matmul %45, %46, %cst_28 {dimension_numbers = #tpu.dot_dimension_numbers<[1], [1], [0], [0], [0, 0, 1, 0], [], []>} : vector<8x8xf32>, vector<8x8xf32>, vector<8x8xf32> -> vector<8x8xf32>
    %cst_29 = arith.constant 0.000000e+00 : f32
    %49 = vector.shape_cast %6 : vector<8x1xi1> to vector<8x1xi1>
    %50 = vector.broadcast %49 : vector<8x1xi1> to vector<8x8xi1>
    %51 = vector.broadcast %cst_29 : f32 to vector<8x8xf32>
    %52 = arith.select %50, %48, %51 : vector<8x8xi1>, vector<8x8xf32>
    %c0_30 = arith.constant 0 : index
    %c1 = arith.constant 1 : index
    %53 = vector.load %arg7[%c0_30, %c1] : memref<8x4xf32, #tpu.memory_space<vmem>>, vector<8x1xf32>
    %cst_31 = arith.constant dense<0xFF800000> : vector<8xf32>
    %54 = vector.multi_reduction <maximumf>, %52, %cst_31 [1] : vector<8x8xf32> to vector<8xf32>
    %55 = vector.shape_cast %54 : vector<8xf32> to vector<8x1xf32>
    %56 = arith.maximumf %53, %55 : vector<8x1xf32>
    %57 = arith.subf %53, %56 : vector<8x1xf32>
    %58 = math.exp %57 : vector<8x1xf32>
    %59 = vector.broadcast %56 : vector<8x1xf32> to vector<8x8xf32>
    %60 = arith.subf %52, %59 : vector<8x8xf32>
    %61 = math.exp %60 : vector<8x8xf32>
    %c0_32 = arith.constant 0 : index
    %c1_33 = arith.constant 1 : index
    %62 = vector.load %arg8[%c0_32, %c1_33] : memref<8x4xf32, #tpu.memory_space<vmem>>, vector<8x1xf32>
    %63 = arith.mulf %58, %62 : vector<8x1xf32>
    %cst_34 = arith.constant dense<0.000000e+00> : vector<8xf32>
    %64 = vector.multi_reduction <add>, %61, %cst_34 [1] : vector<8x8xf32> to vector<8xf32>
    %65 = vector.shape_cast %64 : vector<8xf32> to vector<8x1xf32>
    %66 = arith.addf %63, %65 : vector<8x1xf32>
    %c0_35 = arith.constant 0 : index
    %c1_36 = arith.constant 1 : index
    %67 = vector.load %arg8[%c0_35, %c1_36] : memref<8x4xf32, #tpu.memory_space<vmem>>, vector<8x1xf32>
    tpu.vector_store %arg8[%c0_35, %c1_36], %66 {strides = array<i32>} : memref<8x4xf32, #tpu.memory_space<vmem>>, vector<8x1xf32>,
    %c0_37 = arith.constant 0 : index
    %c8 = arith.constant 8 : index
    %68 = vector.load %arg9[%c0_37, %c8] : memref<8x32xf32, #tpu.memory_space<vmem>>, vector<8x8xf32>
    %69 = vector.broadcast %58 : vector<8x1xf32> to vector<8x8xf32>
    %70 = arith.mulf %69, %68 : vector<8x8xf32>
    %cst_38 = arith.constant dense<0.000000e+00> : vector<8x8xf32>
    %71 = tpu.matmul %61, %47, %cst_38 {dimension_numbers = #tpu.dot_dimension_numbers<[1], [0], [0], [1], [0, 0, 1, 1], [], []>} : vector<8x8xf32>, vector<8x8xf32>, vector<8x8xf32> -> vector<8x8xf32>
    %72 = arith.addf %70, %71 : vector<8x8xf32>
    %c0_39 = arith.constant 0 : index
    %c8_40 = arith.constant 8 : index
    %73 = vector.load %arg9[%c0_39, %c8_40] : memref<8x32xf32, #tpu.memory_space<vmem>>, vector<8x8xf32>
    tpu.vector_store %arg9[%c0_39, %c8_40], %72 {strides = array<i32>} : memref<8x32xf32, #tpu.memory_space<vmem>>, vector<8x8xf32>,
    %c0_41 = arith.constant 0 : index
    %c1_42 = arith.constant 1 : index
    %74 = vector.load %arg7[%c0_41, %c1_42] : memref<8x4xf32, #tpu.memory_space<vmem>>, vector<8x1xf32>
    tpu.vector_store %arg7[%c0_41, %c1_42], %56 {strides = array<i32>} : memref<8x4xf32, #tpu.memory_space<vmem>>, vector<8x1xf32>,
    %75 = vector.extract_strided_slice %8 {offsets = [0, 16], sizes = [8, 8], strides = [1, 1]} : vector<8x96xf32> to vector<8x8xf32>
    %cst_43 = arith.constant 0.353553385 : f32
    %76 = vector.broadcast %cst_43 : f32 to vector<8x8xf32>
    %77 = arith.mulf %75, %76 : vector<8x8xf32>
    %78 = vector.extract_strided_slice %10 {offsets = [0, 48], sizes = [8, 8], strides = [1, 1]} : vector<8x96xf32> to vector<8x8xf32>
    %79 = vector.extract_strided_slice %10 {offsets = [0, 80], sizes = [8, 8], strides = [1, 1]} : vector<8x96xf32> to vector<8x8xf32>
    %cst_44 = arith.constant dense<0.000000e+00> : vector<8x8xf32>
    %80 = tpu.matmul %77, %78, %cst_44 {dimension_numbers = #tpu.dot_dimension_numbers<[1], [1], [0], [0], [0, 0, 1, 0], [], []>} : vector<8x8xf32>, vector<8x8xf32>, vector<8x8xf32> -> vector<8x8xf32>
    %cst_45 = arith.constant 0.000000e+00 : f32
    %81 = vector.shape_cast %6 : vector<8x1xi1> to vector<8x1xi1>
    %82 = vector.broadcast %81 : vector<8x1xi1> to vector<8x8xi1>
    %83 = vector.broadcast %cst_45 : f32 to vector<8x8xf32>
    %84 = arith.select %82, %80, %83 : vector<8x8xi1>, vector<8x8xf32>
    %c0_46 = arith.constant 0 : index
    %c2 = arith.constant 2 : index
    %85 = vector.load %arg7[%c0_46, %c2] : memref<8x4xf32, #tpu.memory_space<vmem>>, vector<8x1xf32>
    %cst_47 = arith.constant dense<0xFF800000> : vector<8xf32>
    %86 = vector.multi_reduction <maximumf>, %84, %cst_47 [1] : vector<8x8xf32> to vector<8xf32>
    %87 = vector.shape_cast %86 : vector<8xf32> to vector<8x1xf32>
    %88 = arith.maximumf %85, %87 : vector<8x1xf32>
    %89 = arith.subf %85, %88 : vector<8x1xf32>
    %90 = math.exp %89 : vector<8x1xf32>
    %91 = vector.broadcast %88 : vector<8x1xf32> to vector<8x8xf32>
    %92 = arith.subf %84, %91 : vector<8x8xf32>
    %93 = math.exp %92 : vector<8x8xf32>
    %c0_48 = arith.constant 0 : index
    %c2_49 = arith.constant 2 : index
    %94 = vector.load %arg8[%c0_48, %c2_49] : memref<8x4xf32, #tpu.memory_space<vmem>>, vector<8x1xf32>
    %95 = arith.mulf %90, %94 : vector<8x1xf32>
    %cst_50 = arith.constant dense<0.000000e+00> : vector<8xf32>
    %96 = vector.multi_reduction <add>, %93, %cst_50 [1] : vector<8x8xf32> to vector<8xf32>
    %97 = vector.shape_cast %96 : vector<8xf32> to vector<8x1xf32>
    %98 = arith.addf %95, %97 : vector<8x1xf32>
    %c0_51 = arith.constant 0 : index
    %c2_52 = arith.constant 2 : index
    %99 = vector.load %arg8[%c0_51, %c2_52] : memref<8x4xf32, #tpu.memory_space<vmem>>, vector<8x1xf32>
    tpu.vector_store %arg8[%c0_51, %c2_52], %98 {strides = array<i32>} : memref<8x4xf32, #tpu.memory_space<vmem>>, vector<8x1xf32>,
    %c0_53 = arith.constant 0 : index
    %c16 = arith.constant 16 : index
    %100 = vector.load %arg9[%c0_53, %c16] : memref<8x32xf32, #tpu.memory_space<vmem>>, vector<8x8xf32>
    %101 = vector.broadcast %90 : vector<8x1xf32> to vector<8x8xf32>
    %102 = arith.mulf %101, %100 : vector<8x8xf32>
    %cst_54 = arith.constant dense<0.000000e+00> : vector<8x8xf32>
    %103 = tpu.matmul %93, %79, %cst_54 {dimension_numbers = #tpu.dot_dimension_numbers<[1], [0], [0], [1], [0, 0, 1, 1], [], []>} : vector<8x8xf32>, vector<8x8xf32>, vector<8x8xf32> -> vector<8x8xf32>
    %104 = arith.addf %102, %103 : vector<8x8xf32>
    %c0_55 = arith.constant 0 : index
    %c16_56 = arith.constant 16 : index
    %105 = vector.load %arg9[%c0_55, %c16_56] : memref<8x32xf32, #tpu.memory_space<vmem>>, vector<8x8xf32>
    tpu.vector_store %arg9[%c0_55, %c16_56], %104 {strides = array<i32>} : memref<8x32xf32, #tpu.memory_space<vmem>>, vector<8x8xf32>,
    %c0_57 = arith.constant 0 : index
    %c2_58 = arith.constant 2 : index
    %106 = vector.load %arg7[%c0_57, %c2_58] : memref<8x4xf32, #tpu.memory_space<vmem>>, vector<8x1xf32>
    tpu.vector_store %arg7[%c0_57, %c2_58], %88 {strides = array<i32>} : memref<8x4xf32, #tpu.memory_space<vmem>>, vector<8x1xf32>,
    %107 = vector.extract_strided_slice %8 {offsets = [0, 24], sizes = [8, 8], strides = [1, 1]} : vector<8x96xf32> to vector<8x8xf32>
    %cst_59 = arith.constant 0.353553385 : f32
    %108 = vector.broadcast %cst_59 : f32 to vector<8x8xf32>
    %109 = arith.mulf %107, %108 : vector<8x8xf32>
    %110 = vector.extract_strided_slice %10 {offsets = [0, 56], sizes = [8, 8], strides = [1, 1]} : vector<8x96xf32> to vector<8x8xf32>
    %111 = vector.extract_strided_slice %10 {offsets = [0, 88], sizes = [8, 8], strides = [1, 1]} : vector<8x96xf32> to vector<8x8xf32>
    %cst_60 = arith.constant dense<0.000000e+00> : vector<8x8xf32>
    %112 = tpu.matmul %109, %110, %cst_60 {dimension_numbers = #tpu.dot_dimension_numbers<[1], [1], [0], [0], [0, 0, 1, 0], [], []>} : vector<8x8xf32>, vector<8x8xf32>, vector<8x8xf32> -> vector<8x8xf32>
    %cst_61 = arith.constant 0.000000e+00 : f32
    %113 = vector.shape_cast %6 : vector<8x1xi1> to vector<8x1xi1>
    %114 = vector.broadcast %113 : vector<8x1xi1> to vector<8x8xi1>
    %115 = vector.broadcast %cst_61 : f32 to vector<8x8xf32>
    %116 = arith.select %114, %112, %115 : vector<8x8xi1>, vector<8x8xf32>
    %c0_62 = arith.constant 0 : index
    %c3 = arith.constant 3 : index
    %117 = vector.load %arg7[%c0_62, %c3] : memref<8x4xf32, #tpu.memory_space<vmem>>, vector<8x1xf32>
    %cst_63 = arith.constant dense<0xFF800000> : vector<8xf32>
    %118 = vector.multi_reduction <maximumf>, %116, %cst_63 [1] : vector<8x8xf32> to vector<8xf32>
    %119 = vector.shape_cast %118 : vector<8xf32> to vector<8x1xf32>
    %120 = arith.maximumf %117, %119 : vector<8x1xf32>
    %121 = arith.subf %117, %120 : vector<8x1xf32>
    %122 = math.exp %121 : vector<8x1xf32>
    %123 = vector.broadcast %120 : vector<8x1xf32> to vector<8x8xf32>
    %124 = arith.subf %116, %123 : vector<8x8xf32>
    %125 = math.exp %124 : vector<8x8xf32>
    %c0_64 = arith.constant 0 : index
    %c3_65 = arith.constant 3 : index
    %126 = vector.load %arg8[%c0_64, %c3_65] : memref<8x4xf32, #tpu.memory_space<vmem>>, vector<8x1xf32>
    %127 = arith.mulf %122, %126 : vector<8x1xf32>
    %cst_66 = arith.constant dense<0.000000e+00> : vector<8xf32>
    %128 = vector.multi_reduction <add>, %125, %cst_66 [1] : vector<8x8xf32> to vector<8xf32>
    %129 = vector.shape_cast %128 : vector<8xf32> to vector<8x1xf32>
    %130 = arith.addf %127, %129 : vector<8x1xf32>
    %c0_67 = arith.constant 0 : index
    %c3_68 = arith.constant 3 : index
    %131 = vector.load %arg8[%c0_67, %c3_68] : memref<8x4xf32, #tpu.memory_space<vmem>>, vector<8x1xf32>
    tpu.vector_store %arg8[%c0_67, %c3_68], %130 {strides = array<i32>} : memref<8x4xf32, #tpu.memory_space<vmem>>, vector<8x1xf32>,
    %c0_69 = arith.constant 0 : index
    %c24 = arith.constant 24 : index
    %132 = vector.load %arg9[%c0_69, %c24] : memref<8x32xf32, #tpu.memory_space<vmem>>, vector<8x8xf32>
    %133 = vector.broadcast %122 : vector<8x1xf32> to vector<8x8xf32>
    %134 = arith.mulf %133, %132 : vector<8x8xf32>
    %cst_70 = arith.constant dense<0.000000e+00> : vector<8x8xf32>
    %135 = tpu.matmul %125, %111, %cst_70 {dimension_numbers = #tpu.dot_dimension_numbers<[1], [0], [0], [1], [0, 0, 1, 1], [], []>} : vector<8x8xf32>, vector<8x8xf32>, vector<8x8xf32> -> vector<8x8xf32>
    %136 = arith.addf %134, %135 : vector<8x8xf32>
    %c0_71 = arith.constant 0 : index
    %c24_72 = arith.constant 24 : index
    %137 = vector.load %arg9[%c0_71, %c24_72] : memref<8x32xf32, #tpu.memory_space<vmem>>, vector<8x8xf32>
    tpu.vector_store %arg9[%c0_71, %c24_72], %136 {strides = array<i32>} : memref<8x32xf32, #tpu.memory_space<vmem>>, vector<8x8xf32>,
    %c0_73 = arith.constant 0 : index
    %c3_74 = arith.constant 3 : index
    %138 = vector.load %arg7[%c0_73, %c3_74] : memref<8x4xf32, #tpu.memory_space<vmem>>, vector<8x1xf32>
    tpu.vector_store %arg7[%c0_73, %c3_74], %120 {strides = array<i32>} : memref<8x4xf32, #tpu.memory_space<vmem>>, vector<8x1xf32>,
    %c0_i32_75 = arith.constant 0 : i32
    %139 = arith.cmpi eq, %arg2, %c0_i32_75 : i32
    %140 = arith.extui %139 : i1 to i32
    %c0_i32_76 = arith.constant 0 : i32
    %141 = arith.cmpi ne, %140, %c0_i32_76 : i32
    scf.if %141 {
      %c0_77 = arith.constant 0 : index
      %c0_78 = arith.constant 0 : index
      %142 = vector.load %arg8[%c0_77, %c0_78] : memref<8x4xf32, #tpu.memory_space<vmem>>, vector<8x4xf32>
      %143 = tpu.reciprocal %142 : vector<8x4xf32> -> vector<8x4xf32>
      %c0_79 = arith.constant 0 : index
      %c0_80 = arith.constant 0 : index
      %144 = vector.load %arg9[%c0_79, %c0_80] : memref<8x32xf32, #tpu.memory_space<vmem>>, vector<8x8xf32>
      %145 = vector.extract_strided_slice %143 {offsets = [0, 0], sizes = [8, 1], strides = [1, 1]} : vector<8x4xf32> to vector<8x1xf32>
      %146 = vector.broadcast %145 : vector<8x1xf32> to vector<8x8xf32>
      %147 = arith.mulf %144, %146 : vector<8x8xf32>
      %c0_81 = arith.constant 0 : index
      %c8_82 = arith.constant 8 : index
      %148 = vector.load %arg9[%c0_81, %c8_82] : memref<8x32xf32, #tpu.memory_space<vmem>>, vector<8x8xf32>
      %149 = vector.extract_strided_slice %143 {offsets = [0, 1], sizes = [8, 1], strides = [1, 1]} : vector<8x4xf32> to vector<8x1xf32>
      %150 = vector.broadcast %149 : vector<8x1xf32> to vector<8x8xf32>
      %151 = arith.mulf %148, %150 : vector<8x8xf32>
      %c0_83 = arith.constant 0 : index
      %c16_84 = arith.constant 16 : index
      %152 = vector.load %arg9[%c0_83, %c16_84] : memref<8x32xf32, #tpu.memory_space<vmem>>, vector<8x8xf32>
      %153 = vector.extract_strided_slice %143 {offsets = [0, 2], sizes = [8, 1], strides = [1, 1]} : vector<8x4xf32> to vector<8x1xf32>
      %154 = vector.broadcast %153 : vector<8x1xf32> to vector<8x8xf32>
      %155 = arith.mulf %152, %154 : vector<8x8xf32>
      %c0_85 = arith.constant 0 : index
      %c24_86 = arith.constant 24 : index
      %156 = vector.load %arg9[%c0_85, %c24_86] : memref<8x32xf32, #tpu.memory_space<vmem>>, vector<8x8xf32>
      %157 = vector.extract_strided_slice %143 {offsets = [0, 3], sizes = [8, 1], strides = [1, 1]} : vector<8x4xf32> to vector<8x1xf32>
      %158 = vector.broadcast %157 : vector<8x1xf32> to vector<8x8xf32>
      %159 = arith.mulf %156, %158 : vector<8x8xf32>
      %160 = tpu.concatenate %147, %151, %155, %159 in 1 : vector<8x8xf32>, vector<8x8xf32>, vector<8x8xf32>, vector<8x8xf32> -> vector<8x32xf32>
      %c0_87 = arith.constant 0 : index
      %c0_88 = arith.constant 0 : index
      %c0_89 = arith.constant 0 : index
      %161 = vector.load %arg6[%c0_87, %c0_88, %c0_89] : memref<1x8x32xf32, #tpu.memory_space<vmem>>, vector<1x8x32xf32>
      %162 = vector.shape_cast %161 : vector<1x8x32xf32> to vector<8x32xf32>
      %163 = vector.shape_cast %160 : vector<8x32xf32> to vector<1x8x32xf32>
      tpu.vector_store %arg6[%c0_87, %c0_88, %c0_89], %163 {strides = array<i32>} : memref<1x8x32xf32, #tpu.memory_space<vmem>>, vector<1x8x32xf32>,
    } else {
    }
    return
  }
  func.func @transform_0(%arg0: i32, %arg1: i32, %arg2: i32) -> (i32, i32, i32) {
    %c0_i32 = arith.constant 0 : i32
    %c0_i32_0 = arith.constant 0 : i32
    return %arg0, %arg1, %c0_i32 : i32, i32, i32
  }
  func.func @transform_1(%arg0: i32, %arg1: i32, %arg2: i32) -> (i32, i32, i32) {
    %c0_i32 = arith.constant 0 : i32
    %c0_i32_0 = arith.constant 0 : i32
    return %arg0, %arg2, %c0_i32 : i32, i32, i32
  }
  func.func @transform_2(%arg0: i32, %arg1: i32, %arg2: i32) -> (i32, i32, i32) {
    %c0_i32 = arith.constant 0 : i32
    %c0_i32_0 = arith.constant 0 : i32
    return %arg0, %arg1, %c0_i32 : i32, i32, i32
  }
  func.func @transform_3(%arg0: i32, %arg1: i32, %arg2: i32) -> (i32, i32, i32) {
    %c0_i32 = arith.constant 0 : i32
    %c0_i32_0 = arith.constant 0 : i32
    return %arg0, %arg1, %c0_i32 : i32, i32, i32
  }
}

module attributes {stable_mosaic.version = 11 : i64} {
  func.func @_ln_ffn_residual_kernel(%arg0: i32, %arg1: i32, %arg2: memref<16x32xf32, #tpu.memory_space<vmem>>, %arg3: memref<1x32xf32, #tpu.memory_space<vmem>>, %arg4: memref<1x32xf32, #tpu.memory_space<vmem>>, %arg5: memref<32x64xf32, #tpu.memory_space<vmem>>, %arg6: memref<1x64xf32, #tpu.memory_space<vmem>>, %arg7: memref<64x32xf32, #tpu.memory_space<vmem>>, %arg8: memref<1x32xf32, #tpu.memory_space<vmem>>, %arg9: memref<16x32xf32, #tpu.memory_space<vmem>>, %arg10: memref<16x32xf32, #tpu.memory_space<vmem>>, %arg11: memref<16x32xf32, #tpu.memory_space<vmem>>) attributes {dimension_semantics = [#tpu.dimension_semantics<parallel>, #tpu.dimension_semantics<arbitrary>], iteration_bounds = array<i64: 1, 1>, scalar_prefetch = 0 : i64, scratch_operands = 2 : i64, tpu.core_type = #tpu.core_type<tc>, window_params = [{transform_indices = @transform_0, window_bounds = array<i64: 16, 32>}, {pipeline_mode = #tpu.pipeline_mode<synchronous>, transform_indices = @transform_1, window_bounds = array<i64: 1, 32>}, {pipeline_mode = #tpu.pipeline_mode<synchronous>, transform_indices = @transform_2, window_bounds = array<i64: 1, 32>}, {transform_indices = @transform_3, window_bounds = array<i64: 32, 64>}, {transform_indices = @transform_4, window_bounds = array<i64: 1, 64>}, {transform_indices = @transform_5, window_bounds = array<i64: 64, 32>}, {pipeline_mode = #tpu.pipeline_mode<synchronous>, transform_indices = @transform_6, window_bounds = array<i64: 1, 32>}, {transform_indices = @transform_7, window_bounds = array<i64: 16, 32>}]} {
    %c0_i32 = arith.constant 0 : i32
    %0 = arith.cmpi eq, %arg1, %c0_i32 : i32
    %1 = arith.extui %0 : i1 to i32
    %c0_i32_0 = arith.constant 0 : i32
    %2 = arith.cmpi ne, %1, %c0_i32_0 : i32
    scf.if %2 {
      %cst_16 = arith.constant 0.000000e+00 : f32
      %19 = vector.broadcast %cst_16 : f32 to vector<16x32xf32>
      %c0_17 = arith.constant 0 : index
      %c0_18 = arith.constant 0 : index
      %20 = vector.load %arg10[%c0_17, %c0_18] : memref<16x32xf32, #tpu.memory_space<vmem>>, vector<16x32xf32>
      tpu.vector_store %arg10[%c0_17, %c0_18], %19 {strides = array<i32>} : memref<16x32xf32, #tpu.memory_space<vmem>>, vector<16x32xf32>,
      %c0_19 = arith.constant 0 : index
      %c0_20 = arith.constant 0 : index
      %21 = vector.load %arg2[%c0_19, %c0_20] : memref<16x32xf32, #tpu.memory_space<vmem>>, vector<16x32xf32>
      %c0_21 = arith.constant 0 : index
      %c0_22 = arith.constant 0 : index
      %22 = vector.load %arg3[%c0_21, %c0_22] : memref<1x32xf32, #tpu.memory_space<vmem>>, vector<1x32xf32>
      %c0_23 = arith.constant 0 : index
      %c0_24 = arith.constant 0 : index
      %23 = vector.load %arg4[%c0_23, %c0_24] : memref<1x32xf32, #tpu.memory_space<vmem>>, vector<1x32xf32>
      %cst_25 = arith.constant dense<0.000000e+00> : vector<16xf32>
      %24 = vector.multi_reduction <add>, %21, %cst_25 [1] : vector<16x32xf32> to vector<16xf32>
      %25 = vector.shape_cast %24 : vector<16xf32> to vector<16x1xf32>
      %cst_26 = arith.constant 3.200000e+01 : f32
      %26 = vector.broadcast %cst_26 : f32 to vector<16x1xf32>
      %27 = arith.divf %25, %26 : vector<16x1xf32>
      %28 = vector.broadcast %27 : vector<16x1xf32> to vector<16x32xf32>
      %29 = arith.subf %21, %28 : vector<16x32xf32>
      %30 = arith.mulf %29, %29 : vector<16x32xf32>
      %cst_27 = arith.constant dense<0.000000e+00> : vector<16xf32>
      %31 = vector.multi_reduction <add>, %30, %cst_27 [1] : vector<16x32xf32> to vector<16xf32>
      %32 = vector.shape_cast %31 : vector<16xf32> to vector<16x1xf32>
      %cst_28 = arith.constant 3.200000e+01 : f32
      %33 = vector.broadcast %cst_28 : f32 to vector<16x1xf32>
      %34 = arith.divf %32, %33 : vector<16x1xf32>
      %35 = vector.broadcast %27 : vector<16x1xf32> to vector<16x32xf32>
      %36 = arith.subf %21, %35 : vector<16x32xf32>
      %cst_29 = arith.constant 9.99999974E-6 : f32
      %37 = vector.broadcast %cst_29 : f32 to vector<16x1xf32>
      %38 = arith.addf %34, %37 : vector<16x1xf32>
      %39 = math.rsqrt %38 : vector<16x1xf32>
      %40 = vector.broadcast %39 : vector<16x1xf32> to vector<16x32xf32>
      %41 = arith.mulf %36, %40 : vector<16x32xf32>
      %42 = vector.broadcast %22 : vector<1x32xf32> to vector<16x32xf32>
      %43 = arith.mulf %41, %42 : vector<16x32xf32>
      %44 = vector.broadcast %23 : vector<1x32xf32> to vector<16x32xf32>
      %45 = arith.addf %43, %44 : vector<16x32xf32>
      %c0_30 = arith.constant 0 : index
      %c0_31 = arith.constant 0 : index
      %46 = vector.load %arg11[%c0_30, %c0_31] : memref<16x32xf32, #tpu.memory_space<vmem>>, vector<16x32xf32>
      tpu.vector_store %arg11[%c0_30, %c0_31], %45 {strides = array<i32>} : memref<16x32xf32, #tpu.memory_space<vmem>>, vector<16x32xf32>,
    } else {
    }
    %c0 = arith.constant 0 : index
    %c0_1 = arith.constant 0 : index
    %3 = vector.load %arg11[%c0, %c0_1] : memref<16x32xf32, #tpu.memory_space<vmem>>, vector<16x32xf32>
    %c0_2 = arith.constant 0 : index
    %c0_3 = arith.constant 0 : index
    %4 = vector.load %arg5[%c0_2, %c0_3] : memref<32x64xf32, #tpu.memory_space<vmem>>, vector<32x64xf32>
    %cst = arith.constant dense<0.000000e+00> : vector<16x64xf32>
    %5 = tpu.matmul %3, %4, %cst {dimension_numbers = #tpu.dot_dimension_numbers<[1], [0], [0], [1], [0, 0, 1, 1], [], []>} : vector<16x32xf32>, vector<32x64xf32>, vector<16x64xf32> -> vector<16x64xf32>
    %c0_4 = arith.constant 0 : index
    %c0_5 = arith.constant 0 : index
    %6 = vector.load %arg6[%c0_4, %c0_5] : memref<1x64xf32, #tpu.memory_space<vmem>>, vector<1x64xf32>
    %7 = vector.broadcast %6 : vector<1x64xf32> to vector<16x64xf32>
    %8 = arith.addf %5, %7 : vector<16x64xf32>
    %cst_6 = arith.constant 0.000000e+00 : f32
    %9 = vector.broadcast %cst_6 : f32 to vector<16x64xf32>
    %10 = arith.maximumf %8, %9 : vector<16x64xf32>
    %c0_7 = arith.constant 0 : index
    %c0_8 = arith.constant 0 : index
    %11 = vector.load %arg10[%c0_7, %c0_8] : memref<16x32xf32, #tpu.memory_space<vmem>>, vector<16x32xf32>
    %c0_9 = arith.constant 0 : index
    %c0_10 = arith.constant 0 : index
    %12 = vector.load %arg7[%c0_9, %c0_10] : memref<64x32xf32, #tpu.memory_space<vmem>>, vector<64x32xf32>
    %cst_11 = arith.constant dense<0.000000e+00> : vector<16x32xf32>
    %13 = tpu.matmul %10, %12, %cst_11 {dimension_numbers = #tpu.dot_dimension_numbers<[1], [0], [0], [1], [0, 0, 1, 1], [], []>} : vector<16x64xf32>, vector<64x32xf32>, vector<16x32xf32> -> vector<16x32xf32>
    %14 = arith.addf %11, %13 : vector<16x32xf32>
    %c0_12 = arith.constant 0 : index
    %c0_13 = arith.constant 0 : index
    %15 = vector.load %arg10[%c0_12, %c0_13] : memref<16x32xf32, #tpu.memory_space<vmem>>, vector<16x32xf32>
    tpu.vector_store %arg10[%c0_12, %c0_13], %14 {strides = array<i32>} : memref<16x32xf32, #tpu.memory_space<vmem>>, vector<16x32xf32>,
    %c0_i32_14 = arith.constant 0 : i32
    %16 = arith.cmpi eq, %arg1, %c0_i32_14 : i32
    %17 = arith.extui %16 : i1 to i32
    %c0_i32_15 = arith.constant 0 : i32
    %18 = arith.cmpi ne, %17, %c0_i32_15 : i32
    scf.if %18 {
      %c0_16 = arith.constant 0 : index
      %c0_17 = arith.constant 0 : index
      %19 = vector.load %arg10[%c0_16, %c0_17] : memref<16x32xf32, #tpu.memory_space<vmem>>, vector<16x32xf32>
      %c0_18 = arith.constant 0 : index
      %c0_19 = arith.constant 0 : index
      %20 = vector.load %arg8[%c0_18, %c0_19] : memref<1x32xf32, #tpu.memory_space<vmem>>, vector<1x32xf32>
      %21 = vector.broadcast %20 : vector<1x32xf32> to vector<16x32xf32>
      %22 = arith.addf %19, %21 : vector<16x32xf32>
      %c0_20 = arith.constant 0 : index
      %c0_21 = arith.constant 0 : index
      %23 = vector.load %arg2[%c0_20, %c0_21] : memref<16x32xf32, #tpu.memory_space<vmem>>, vector<16x32xf32>
      %24 = arith.addf %22, %23 : vector<16x32xf32>
      %c0_22 = arith.constant 0 : index
      %c0_23 = arith.constant 0 : index
      %25 = vector.load %arg9[%c0_22, %c0_23] : memref<16x32xf32, #tpu.memory_space<vmem>>, vector<16x32xf32>
      tpu.vector_store %arg9[%c0_22, %c0_23], %24 {strides = array<i32>} : memref<16x32xf32, #tpu.memory_space<vmem>>, vector<16x32xf32>,
    } else {
    }
    return
  }
  func.func @transform_0(%arg0: i32, %arg1: i32) -> (i32, i32) {
    %c0_i32 = arith.constant 0 : i32
    %c0_i32_0 = arith.constant 0 : i32
    return %arg0, %c0_i32 : i32, i32
  }
  func.func @transform_1(%arg0: i32, %arg1: i32) -> (i32, i32) {
    %c0_i32 = arith.constant 0 : i32
    %c0_i32_0 = arith.constant 0 : i32
    %c0_i32_1 = arith.constant 0 : i32
    return %c0_i32, %c0_i32_0 : i32, i32
  }
  func.func @transform_2(%arg0: i32, %arg1: i32) -> (i32, i32) {
    %c0_i32 = arith.constant 0 : i32
    %c0_i32_0 = arith.constant 0 : i32
    %c0_i32_1 = arith.constant 0 : i32
    return %c0_i32, %c0_i32_0 : i32, i32
  }
  func.func @transform_3(%arg0: i32, %arg1: i32) -> (i32, i32) {
    %c0_i32 = arith.constant 0 : i32
    %c0_i32_0 = arith.constant 0 : i32
    return %c0_i32, %arg1 : i32, i32
  }
  func.func @transform_4(%arg0: i32, %arg1: i32) -> (i32, i32) {
    %c0_i32 = arith.constant 0 : i32
    %c0_i32_0 = arith.constant 0 : i32
    return %c0_i32, %arg1 : i32, i32
  }
  func.func @transform_5(%arg0: i32, %arg1: i32) -> (i32, i32) {
    %c0_i32 = arith.constant 0 : i32
    %c0_i32_0 = arith.constant 0 : i32
    return %arg1, %c0_i32 : i32, i32
  }
  func.func @transform_6(%arg0: i32, %arg1: i32) -> (i32, i32) {
    %c0_i32 = arith.constant 0 : i32
    %c0_i32_0 = arith.constant 0 : i32
    %c0_i32_1 = arith.constant 0 : i32
    return %c0_i32, %c0_i32_0 : i32, i32
  }
  func.func @transform_7(%arg0: i32, %arg1: i32) -> (i32, i32) {
    %c0_i32 = arith.constant 0 : i32
    %c0_i32_0 = arith.constant 0 : i32
    return %arg0, %c0_i32 : i32, i32
  }
}

</mosaic_0001>

<bundles_post_ra>
// kernel: encoder_layer.6
= control target key start
LH: loop header
LB: loop body
LE: loop exit
PB: predicated region body
PF: predicated region fallthrough
CT: control target
= control target key end

     0   :  { %9 = vsyncpa [#allocation3], 0  ;;  %s257_s0 = inlined_call_operand.vmem [shape: f32[16,32], index: 0, kind: input, shape index: {}]   ;;  %s258_s1 = inlined_call_operand.hbm [shape: f32[32,32], index: 1, kind: input, shape index: {}]   ;;  %s259_s2 = inlined_call_operand.hbm [shape: f32[1,32], index: 2, kind: input, shape index: {}]   ;;  %s260_s3 = inlined_call_operand.hbm [shape: f32[16,32], index: 3, kind: input, shape index: {}]   ;;  %s261_s4 = inlined_call_operand.vmem [shape: f32[16,32], index: 4, kind: output, shape index: {}]  }
   0x1   :  { %10 = vsyncpa [#allocation5], 0  ;;  %s31_s17 = sshll.u32 %s259_s2, 4  ;;  %s202_s18 = smov [#allocation4]   ;;  %s32_s17 = int_to_ptr.hbm [resolvable:$true] %s31_s17 }
   0x2   :  { %s33_s19 = sshll.u32 %s202_s18, 4  ;;  %s17_s22 = sshll.u32 %s258_s1, 4  ;;  %s34_s19 = int_to_ptr.vmem [resolvable:$true] %s33_s19  ;;  %s18_s22 = int_to_ptr.hbm [resolvable:$true] %s17_s22 }
   0x3   :  { %36 = dma.hbm_to_vmem [thread:$0]  %s32_s17, 16, %s34_s19, [#allocation5]  }
   0x4   :  { %s203_s23 = smov [#allocation2]   ;;  %s204_s25 = smov 128  }
   0x5   :  { %s19_s24 = sshll.u32 %s203_s23, 4  ;;  %s205_s26 = smov 8   ;;  %s20_s24 = int_to_ptr.vmem [resolvable:$true] %s19_s24 }
   0x6   :  { %25 = dma.hbm_to_vmem [thread:$0]  %s18_s22, 512, %s20_s24, [#allocation3], %s204_s25, %s204_s25, %s205_s26  }
   0x7   :  { %s41_s2 = sshll.u32 %s260_s3, 4  ;;  %s206_s29 = smov [#allocation6]   ;;  %s42_s2 = int_to_ptr.hbm [resolvable:$true] %s41_s2 }
   0x8   :  { %s43_s30 = sshll.u32 %s206_s29, 4  ;;  %s44_s30 = int_to_ptr.vmem [resolvable:$true] %s43_s30 }
   0x9   :  { %49 = dma.hbm_to_vmem [thread:$0]  %s42_s2, 256, %s44_s30, [#allocation5], %s204_s25, %s204_s25, %s205_s26  }
   0xa   :  { %198 = dma.done.wait [#allocation3], 512  }
   0xb   :  { %199 = vsyncadd [#allocation3], 4294966784 }
   0xc   :  { %200 = dma.done.wait [#allocation5], 272  }
   0xd   :  { %201 = vsyncadd [#allocation5], 4294967024  ;;  %v67_v0 = vld [vmem:[#allocation2 + $0x18] sm:$0xff]  ;;  %v66_v1 = vld [vmem:[#allocation2 + $0x10] sm:$0xff]  ;;  %vm72_vm0 = vcmask 261120  }
   0xe   :  { %91 = vmatpush.msra.mxu0 %v67_v0  ;;  %116 = vmatpush.msra.mxu1 %v67_v0  ;;  %v65_v2 = vld [vmem:[#allocation2 + $0x8] sm:$0xff]  ;;  %v64_v3 = vld [vmem:[#allocation2] sm:$0xff] }
   0xf   :  { %v62_v4 = vld [vmem:[%s257_s0] sm:$0xff]  ;;  %v63_v5 = vld [vmem:[%s257_s0 + $0x8] sm:$0xff] }
  0x10   :  { %92 = vmatpush.msra.mxu0 %v66_v1  ;;  %117 = vmatpush.msra.mxu1 %v66_v1  ;;  %v125_v6 = vld [vmem:[#allocation4] ss:$0 sm:$0xff]  ;;  %v102_v8 = vld [vmem:[#allocation6] sm:$0xff]  ;;  %v103_v10 = vld [vmem:[#allocation6 + $0x8] sm:$0xff] }
  0x12   :  { %93 = vmatpush.msra.mxu0 %v65_v2  ;;  %118 = vmatpush.msra.mxu1 %v65_v2 }
  0x14   :  { %94 = vmatpush.msra.mxu0 %v64_v3  ;;  %119 = vmatpush.msra.mxu1 %v64_v3 }
  0x15   :  { %114 = vmatmul.msk.f32.vlgmr.msra.gmra.mxu0 %vm72_vm0, %v62_v4  ;;  %115 = vmatmul.msk.f32.vlgmr.msra.gmra.mxu1 %vm72_vm0, %v63_v5 }
  0x92   :  { %v96_v7 = vpop.f32.mrf.mxu0  ;;  %v99_v9 = vpop.f32.mrf.mxu1 }
  0x93   :  { %v97_v11 = vadd.f32 %v125_v6, %v96_v7  ;;  %v100_v12 = vadd.f32 %v125_v6, %v99_v9 }
  0x95   :  { %v104_v13 = vadd.f32 %v102_v8, %v97_v11  ;;  %v105_v14 = vadd.f32 %v103_v10, %v100_v12 }
  0x97   :  { %106 = vst.msk [vmem:[%s261_s4] sm:$0xff] %vm72_vm0, %v104_v13 }
  0x98   :  { %107 = vst.msk [vmem:[%s261_s4 + $0x8] sm:$0xff] %vm72_vm0, %v105_v14 }
  0x99   :  { %112 = vsyncpa [#allocation3], 1 }
  0x9a   :  { %113 = vsyncpa [#allocation5], 1 }

// kernel: encoder_layer.4
= control target key start
LH: loop header
LB: loop body
LE: loop exit
PB: predicated region body
PF: predicated region fallthrough
CT: control target
= control target key end

     0   :  { %10 = vsyncpa [#allocation3], 0  ;;  %s298_s0 = inlined_call_operand.hbm [shape: f32[16,32], index: 0, kind: input, shape index: {}]   ;;  %s299_s1 = inlined_call_operand.vmem [shape: f32[1,32], index: 1, kind: input, shape index: {}]   ;;  %s300_s2 = inlined_call_operand.vmem [shape: f32[1,32], index: 2, kind: input, shape index: {}]   ;;  %s301_s3 = inlined_call_operand.hbm [shape: f32[32,96], index: 3, kind: input, shape index: {}]   ;;  %s302_s4 = inlined_call_operand.vmem [shape: f32[1,96], index: 4, kind: input, shape index: {}]   ;;  %s303_s5 = inlined_call_operand.vmem [shape: f32[16,96], index: 5, kind: output, shape index: {}]  }
   0x1   :  { %s16_s20 = sshll.u32 %s298_s0, 4  ;;  %s17_s20 = int_to_ptr.hbm [resolvable:$true] %s16_s20 }
   0x2   :  { %11 = vsyncpa [#allocation5], 0  ;;  %s236_s21 = smov [#allocation2]   ;;  %s33_s25 = sshll.u32 %s301_s3, 4  ;;  %s34_s25 = int_to_ptr.hbm [resolvable:$true] %s33_s25 }
   0x3   :  { %s18_s22 = sshll.u32 %s236_s21, 4  ;;  %s237_s26 = smov 128   ;;  %s19_s22 = int_to_ptr.vmem [resolvable:$true] %s18_s22 }
   0x4   :  { %s238_s27 = smov 8   ;;  %s239_s28 = smov [#allocation4]  }
   0x5   :  { %24 = dma.hbm_to_vmem [thread:$0]  %s17_s20, 256, %s19_s22, [#allocation3], %s237_s26, %s237_s26, %s238_s27  }
   0x6   :  { %s35_s29 = sshll.u32 %s239_s28, 4  ;;  %s36_s29 = int_to_ptr.vmem [resolvable:$true] %s35_s29 }
   0x7   :  { %41 = dma.hbm_to_vmem [thread:$0]  %s34_s25, 512, %s36_s29, [#allocation5], %s237_s26, %s237_s26, %s238_s27  }
   0x8   :  { %232 = dma.done.wait [#allocation3], 256  }
   0x9   :  { %233 = vsyncadd [#allocation3], 4294967040 }
   0xa   :  { %234 = dma.done.wait [#allocation5], 512  }
   0xb   :  { %235 = vsyncadd [#allocation5], 4294966784  ;;  %vm56_vm0 = vcmask 261120   ;;  %v52_v0 = vld [vmem:[#allocation2] sm:$0xff]  ;;  %v53_v2 = vld [vmem:[#allocation2 + $0x8] sm:$0xff]  ;;  %v240_v4 = vmov 32.0  }
   0xc   :  { %v57_v1 = vsel %vm56_vm0, %v52_v0, 0.0  ;;  %v60_v3 = vsel %vm56_vm0, %v53_v2, 0.0  ;;  %178 = vrcp.f32 %v240_v4  ;;  %v121_v21 = vld [vmem:[#allocation4 + $0x18] sm:$0xff]  ;;  %v120_v22 = vld [vmem:[#allocation4 + $0x10] sm:$0xff]  ;;  %v119_v23 = vld [vmem:[#allocation4 + $0x8] sm:$0xff]  ;;  %vm155_vm8 = vcmask 785408  }
   0xd   :  { %58 = vadd.xlane.f32.xlu0 %v57_v1  ;;  %144 = vmatpush.msra.mxu0 %v121_v21  ;;  %v118_v24 = vld [vmem:[#allocation4] sm:$0xff]  ;;  %v175_v39 = vld [vmem:[%s299_s1] ss:$0 sm:$0xff] }
   0xe   :  { %166 = vmatpush.msra.mxu1 %v121_v21  ;;  %v176_v43 = vld [vmem:[%s300_s2] ss:$0 sm:$0xff] }
   0xf   :  { %145 = vmatpush.msra.mxu0 %v120_v22  ;;  %v177_v53 = vld [vmem:[%s302_s4] ss:$0 sm:$0xff] }
  0x10   :  { %167 = vmatpush.msra.mxu1 %v120_v22 }
  0x11   :  { %146 = vmatpush.msra.mxu0 %v119_v23 }
  0x12   :  { %v179_v5 = vpop.eup %178  ;;  %168 = vmatpush.msra.mxu1 %v119_v23 }
  0x13   :  { %v64_v6 = vmul.f32 32.0, %v179_v5  ;;  %vm68_vm1 = vweird.f32 %v179_v5  ;;  %147 = vmatpush.msra.mxu0 %v118_v24 }
  0x14   :  { %169 = vmatpush.msra.mxu1 %v118_v24 }
  0x15   :  { %61 = vadd.xlane.f32.xlu0 %v60_v3  ;;  %v65_v7 = vsub.f32 1.0, %v64_v6 }
  0x17   :  { %v66_v8 = vmul.f32 %v179_v5, %v65_v7 }
  0x19   :  { %v67_v9 = vadd.f32 %v179_v5, %v66_v8 }
  0x1b   :  { %v69_v10 = vsel %vm68_vm1, %v179_v5, %v67_v9 }
  0x80   :  { %v59_v11 = vpop.xlane.xlu0 %58 }
  0x81   :  { %v70_v12 = vmul.f32 %v69_v10, %v59_v11 }
  0x83   :  { %v72_v13 = vsub.f32 %v52_v0, %v70_v12 }
  0x85   :  { %v74_v14 = vmul.f32 %v72_v13, %v72_v13 }
  0x87   :  { %v76_v15 = vsel %vm56_vm0, %v74_v14, 0.0 }
  0x88   :  { %77 = vadd.xlane.f32.xlu1 %v76_v15  ;;  %v62_v16 = vpop.xlane.xlu0 %61 }
  0x89   :  { %v71_v17 = vmul.f32 %v69_v10, %v62_v16 }
  0x8b   :  { %v73_v18 = vsub.f32 %v53_v2, %v71_v17 }
  0x8d   :  { %v75_v19 = vmul.f32 %v73_v18, %v73_v18 }
  0x8f   :  { %v79_v20 = vsel %vm56_vm0, %v75_v19, 0.0 }
  0x90   :  { %80 = vadd.xlane.f32.xlu1 %v79_v20 }
  0xfb   :  { %v78_v25 = vpop.xlane.xlu1 %77 }
  0xfc   :  { %v82_v26 = vmul.f32 %v78_v25, %v69_v10 }
  0xfe   :  { %v84_v27 = vadd.f32 1e-05, %v82_v26 }
 0x100   :  { %180 = vrsqrt.f32 %v84_v27  ;;  %vm92_vm3 = vweird.f32 %v84_v27 }
 0x103   :  { %v81_v28 = vpop.xlane.xlu1 %80 }
 0x104   :  { %v83_v29 = vmul.f32 %v81_v28, %v69_v10 }
 0x106   :  { %v181_v30 = vpop.eup %180  ;;  %v85_v31 = vadd.f32 1e-05, %v83_v29 }
 0x107   :  { %v87_v32 = vmul.f32 %v181_v30, %v84_v27  ;;  %vm93_vm2 = vweird.f32 %v181_v30 }
 0x108   :  { %182 = vrsqrt.f32 %v85_v31  ;;  %vm94_vm4 = vmor %vm92_vm3, %vm93_vm2  ;;  %vm102_vm6 = vweird.f32 %v85_v31 }
 0x109   :  { %v88_v33 = vmul.f32 %v181_v30, %v87_v32 }
 0x10b   :  { %v89_v34 = vmul.f32 0.5, %v88_v33 }
 0x10d   :  { %v90_v35 = vsub.f32 1.5, %v89_v34 }
 0x10e   :  { %v183_v36 = vpop.eup %182 }
 0x10f   :  { %v91_v37 = vmul.f32 %v181_v30, %v90_v35  ;;  %v97_v38 = vmul.f32 %v183_v36, %v85_v31  ;;  %vm103_vm5 = vweird.f32 %v183_v36 }
 0x110   :  { %vm104_vm7 = vmor %vm102_vm6, %vm103_vm5 }
 0x111   :  { %v95_v40 = vsel %vm94_vm4, %v181_v30, %v91_v37  ;;  %v98_v41 = vmul.f32 %v183_v36, %v97_v38 }
 0x112   :  { %v106_v42 = vmul.f32 %v95_v40, %v72_v13 }
 0x113   :  { %v99_v44 = vmul.f32 0.5, %v98_v41 }
 0x114   :  { %v111_v45 = vmul.f32 %v175_v39, %v106_v42 }
 0x115   :  { %v100_v46 = vsub.f32 1.5, %v99_v44 }
 0x116   :  { %v116_v47 = vadd.f32 %v176_v43, %v111_v45 }
 0x117   :  { %v101_v48 = vmul.f32 %v183_v36, %v100_v46 }
 0x118   :  { %164 = vmatmul.msk.f32.vlgmr.msra.gmra.mxu0 %vm56_vm0, %v116_v47 }
 0x119   :  { %v105_v49 = vsel %vm104_vm7, %v183_v36, %v101_v48 }
 0x11a   :  { %v107_v50 = vmul.f32 %v105_v49, %v73_v18 }
 0x11c   :  { %v112_v51 = vmul.f32 %v175_v39, %v107_v50 }
 0x11e   :  { %v117_v52 = vadd.f32 %v176_v43, %v112_v51 }
 0x120   :  { %165 = vmatmul.msk.f32.vlgmr.msra.gmra.mxu1 %vm56_vm0, %v117_v52 }
 0x195   :  { %v149_v54 = vpop.f32.mrf.mxu0 }
 0x196   :  { %v150_v55 = vadd.f32 %v177_v53, %v149_v54 }
 0x198   :  { %156 = vst.msk [vmem:[%s303_s5] sm:$0xff] %vm155_vm8, %v150_v55 }
 0x19d   :  { %v152_v56 = vpop.f32.mrf.mxu1 }
 0x19e   :  { %v153_v57 = vadd.f32 %v177_v53, %v152_v56 }
 0x1a0   :  { %157 = vst.msk [vmem:[%s303_s5 + $0x8] sm:$0xff] %vm155_vm8, %v153_v57 }
 0x1a1   :  { %162 = vsyncpa [#allocation3], 1 }
 0x1a2   :  { %163 = vsyncpa [#allocation5], 1 }

// kernel: encoder_layer.5
= control target key start
LH: loop header
LB: loop body
LE: loop exit
PB: predicated region body
PF: predicated region fallthrough
CT: control target
= control target key end

     0   :  { %s968_s12 = smov 0   ;;  %s970_s13 = smov 0   ;;  %s1112_s0 = inlined_call_operand.vmem [shape: f32[2,8,96], index: 0, kind: input, shape index: {}, may-alias: {0,1}]   ;;  %s1113_s1 = inlined_call_operand.vmem [shape: f32[2,8,96], index: 1, kind: input, shape index: {}, may-alias: {0,1}]   ;;  %s1114_s2 = inlined_call_operand.vmem [shape: f32[2,8,1], index: 2, kind: input, shape index: {}]   ;;  %s1115_s3 = inlined_call_operand.vmem [shape: f32[2,8,32], index: 3, kind: output, shape index: {}]  }
   0x1   :  { %s972_s14 = smov 0  }
   0x2 LB: > { %s32_s15 = sadd.s32 1, %s922_s13  ;;  %p809_p0 = scmp.ge.s32.totalorder %s926_s14, 1  ;;  %s926_s14 = sphi %s972_s14, %s13_s14   ;;  %s922_s13 = sphi %s970_s13, %s1117_s13   ;;  %s918_s12 = sphi %s968_s12, %s1116_s12  }
   0x3   : > { %p34_p1 = scmp.ge.s32.totalorder %s32_s15, 2  ;;  %p190_p2 = scmp.lt.s32.totalorder %s926_s14, 3 }
   0x5   : > { %s1119_s15 = smov (%p34_p1, %s32_s15), 0  ;;  %p191_p3 = pnand %p809_p0, %p190_p2 }
   0x6   : > { %p232_p4 = scmp.lt.s32.totalorder (!%p191_p3), %s918_s12, 1  ;;  %s928_s20 = smov (!%p191_p3), 96  }
   0x7   : > { %194 = sbr.rel (%p191_p3) target bundleno = 1307 (0x51b), region = 32  ;;  %s930_s27 = smov (!%p191_p3), 80  }
   0x8   : > { %s932_s28 = smov (!%p191_p3), 72   ;;  %s933_s29 = smov (!%p191_p3), 88  }
   0x9   : > { %s935_s30 = smov (!%p191_p3), 120   ;;  %s936_s4 = smov (!%p191_p3), 64  }
   0xa   : > { %s937_s5 = smov (!%p191_p3), 112   ;;  %s938_s6 = smov (!%p191_p3), 104  }
   0xb   : > { %s939_s7 = smov (!%p191_p3), 56   ;;  %s943_s8 = smov (!%p191_p3), 48  }
   0xc   : > { %s1121_s12 = smov (!%p232_p4, %s918_s12), 1  ;;  %v929_v2 = vmov 0   ;;  %vm277_vm1 = vcmask 64512   ;;  %vm264_vm2 = vcmask 31744   ;;  %v931_v8 = vmov -inf   ;;  %s944_s9 = smov 40  }
   0xd   : > { %s986_s16 = sshll.u32 %s1121_s12, 3  ;;  %872 = vset.pattern.permute.xlu0 %v929_v2  ;;  %873 = vset.pattern.permute.xlu2 %v929_v2  ;;  %265 = vst.msk [vmem:[#allocation2] sm:$0xff] %vm264_vm2, %v931_v8  ;;  %v934_v12 = vmov 0.0   ;;  %vm331_vm4 = vcmask 7168   ;;  %v940_v38 = vmov 1   ;;  %v941_v39 = vmov 2  }
   0xe   : > { %s245_s19 = scalar_lea.vmem %s1113_s1, %s986_s16  ;;  %s252_s23 = scalar_lea.vmem %s1114_s2, %s986_s16  ;;  %266 = vst.msk [vmem:[#allocation3] sm:$0xff] %vm264_vm2, %v934_v12  ;;  %874 = vset.pattern.permute.xlu1 %v940_v38  ;;  %v942_v40 = vmov 3   ;;  %vm420_vm5 = vcmask 15368   ;;  %vm514_vm6 = vcmask 23568   ;;  %vm608_vm7 = vcmask 31768  }
   0xf   : > { %v992_v0 = vld [vmem:[%s245_s19] sm:$0xff]  ;;  %s238_s26 = scalar_lea.vmem %s1112_s0, %s986_s16  ;;  %vm267_vm8 = vcmask 261120   ;;  %s945_s10 = smov 8   ;;  %vm460_vm9 = vcmask 130112   ;;  %vm554_vm10 = vcmask 195712   ;;  %vm648_vm11 = vcmask 261312  }
  0x10   : > { %275 = vrot.lane.b32.xlu0 %v992_v0, %s928_s20  ;;  %v269_v1 = vld [vmem:[%s252_s23] sm:$0xff]  ;;  %268 = vst.msk [vmem:[#allocation4] sm:$0xff] %vm267_vm8, %v934_v12  ;;  %s946_s11 = smov 16   ;;  %s947_s12 = smov 24   ;;  %vm694_vm2 = vcmask 195584  }
  0x11   : > { %vm270_vm0 = vcmp.gt.f32.partialorder %v269_v1, 0.0  ;;  %v271_v4 = vld [vmem:[%s238_s26] sm:$0xff]  ;;  %s259_s19 = scalar_lea.vmem %s1115_s3, %s986_s16 }
  0x12   : > { %v303_v3 = vsel %vm270_vm0, 1, %v929_v2  ;;  %v273_v6 = vmul.f32 0.35355338, %v271_v4  ;;  %vm692_vm0 = vcmask 130048  }
  0x14   : > { %v1014_v13 = vld [vmem:[#allocation2] sm:$0xff] }
  0x18   : > { %305 = vperm.xlu0 %872, %v303_v3  }
  0x20   : > { %465 = vrot.lane.b32.xlu0 %v992_v0, %s930_s27 }
  0x21   : > { %875 = vset.pattern.permute.xlu0 %v941_v39 }
  0x28   : > { %559 = vrot.lane.b32.xlu0 %v992_v0, %s932_s28 }
  0x82   : > { %v276_v5 = vpop.permute.xlu0 %275 }
  0x83   : > { %814 = vmatpush.xpose.msk.msra.mxu0 %vm277_vm1, %v276_v5 }
  0x86   : > { %815 = vmatmul.msk.f32.vlgmr.msra.gmra.mxu0 %vm277_vm1, %v273_v6 }
  0x8a   : > { %v306_v7 = vpop.permute.xlu0 %305 }
  0x8b   : > { %vm307_vm3 = vcmp.eq.s32.totalorder %v306_v7, 1 }
  0x92   : > { %v466_v18 = vpop.permute.xlu0 %465 }
  0x9a   : > { %v560_v19 = vpop.permute.xlu0 %559 }
  0x9b   : > { %823 = vmatpush.xpose.msk.msrb.mxu0 %vm277_vm1, %v560_v19  ;;  %v325_v19 = vld [vmem:[#allocation3] sm:$0xff] }
 0x103   : > { %v300_v9 = vpop.f32.mrf.mxu0 }
 0x104   : > { %v308_v10 = vsel %vm307_vm3, %v300_v9, 0.0 }
 0x105   : > { %v310_v11 = vsel %vm277_vm1, %v308_v10, -inf }
 0x106   : > { %311 = vmax.xlane.f32.xlu1 %v310_v11 }
 0x11f   : > { %371 = vrot.lane.b32.xlu1 %v992_v0, %s933_s29 }
 0x179   : > { %v312_v14 = vpop.xlane.xlu1 %311 }
 0x17a   : > { %v1017_v15 = vmax.f32 %v1014_v13, %v312_v14 }
 0x17c   : > { %v314_v16 = vsub.f32 %v1014_v13, %v1017_v15  ;;  %368 = vst.msk [vmem:[#allocation2] sm:$0xff] %vm331_vm4, %v1017_v15  ;;  %319 = vperm.xlu2 %873, %v1017_v15   ;;  %v333_v15 = vld [vmem:[#allocation4] sm:$0xff] }
 0x17e   : > { %v315_v48 = vmul.f32 1.442695, %v314_v16 }
 0x183   : > { %v398_v41 = vld [vmem:[#allocation2] sm:$0xff] }
 0x184   : > { %369 = vrot.lane.b32.xlu2 %v273_v6, %s935_s30 }
 0x185   : > { %876 = vset.pattern.permute.xlu2 %v942_v40 }
 0x18c   : > { %340 = vrot.lane.b32.xlu2 %v992_v0, %s936_s4 }
 0x191   : > { %v372_v17 = vpop.permute.xlu1 %371 }
 0x192   : > { %817 = vmatpush.xpose.msk.msra.mxu2 %vm277_vm1, %v372_v17 }
 0x194   : > { %463 = vrot.lane.b32.xlu2 %v273_v6, %s937_s5 }
 0x19c   : > { %557 = vrot.lane.b32.xlu2 %v273_v6, %s938_s6 }
 0x1d6   : > { %v320_v20 = vpop.permute.xlu2 %319 }
 0x1d7   : > { %v322_v21 = vsub.f32 %v308_v10, %v320_v20 }
 0x1d9   : > { %v323_v22 = vmul.f32 1.442695, %v322_v21 }
 0x1db   : > { %886 = vpow2.f32 %v323_v22 }
 0x1dc   : > { %888 = vpow2.f32 %v315_v48 }
 0x1de   : > { %v370_v23 = vpop.permute.xlu2 %369 }
 0x1df   : > { %818 = vmatmul.msk.f32.vlgmr.msra.gmra.mxu2 %vm277_vm1, %v370_v23 }
 0x1e1   : > { %v1028_v25 = vpop.eup %886 }
 0x1e2   : > { %v889_v55 = vpop.eup %888  ;;  %v327_v57 = vsel %vm277_vm1, %v1028_v25, 0.0 }
 0x1e3   : > { %v326_v20 = vmul.f32 %v889_v55, %v325_v19 }
 0x1e6   : > { %v341_v24 = vpop.permute.xlu2 %340 }
 0x1e7   : > { %361 = vmatpush.msra.mxu1 %v341_v24 }
 0x1e8   : > { %816 = vmatmul.msk.f32.vlgmr.msra.gmra.mxu1 %vm277_vm1, %v1028_v25 }
 0x1e9   : > { %820 = vmatpush.xpose.msk.msrb.mxu1 %vm277_vm1, %v466_v18 }
 0x1ee   : > { %v464_v26 = vpop.permute.xlu2 %463 }
 0x1f0   : > { %821 = vmatmul.msk.f32.vlgmr.msrb.gmra.mxu1 %vm277_vm1, %v464_v26 }
 0x1f6   : > { %v558_v27 = vpop.permute.xlu2 %557 }
 0x1f7   : > { %824 = vmatmul.msk.f32.vlgmr.msrb.gmra.mxu0 %vm277_vm1, %v558_v27 }
 0x262   : > { %v394_v28 = vpop.f32.mrf.mxu2 }
 0x263   : > { %v1036_v29 = vsel %vm307_vm3, %v394_v28, 0.0 }
 0x264   : > { %v399_v30 = vsel %vm277_vm1, %v1036_v29, -inf }
 0x265   : > { %v1040_v31 = vpop.f32.mrf.mxu1  ;;  %400 = vmax.xlane.f32.xlu1 %v399_v30 }
 0x26d   : > { %v488_v32 = vpop.f32.mrf.mxu1 }
 0x26e   : > { %v1043_v33 = vsel %vm307_vm3, %v488_v32, 0.0 }
 0x26f   : > { %v493_v34 = vsel %vm277_vm1, %v1043_v33, -inf }
 0x270   : > { %494 = vmax.xlane.f32.xlu0 %v493_v34 }
 0x274   : > { %v582_v35 = vpop.f32.mrf.mxu0 }
 0x275   : > { %v1048_v36 = vsel %vm307_vm3, %v582_v35, 0.0 }
 0x276   : > { %v587_v37 = vsel %vm277_vm1, %v1048_v36, -inf }
 0x277   : > { %588 = vmax.xlane.f32.xlu2 %v587_v37 }
 0x28f   : > { %429 = vrot.lane.b32.xlu2 %v992_v0, %s939_s7 }
 0x2d8   : > { %v401_v42 = vpop.xlane.xlu1 %400 }
 0x2d9   : > { %v402_v43 = vmax.f32 %v398_v41, %v401_v42 }
 0x2db   : > { %462 = vst.msk [vmem:[#allocation2] sm:$0xff] %vm420_vm5, %v402_v43  ;;  %408 = vperm.xlu1 %874, %v402_v43   ;;  %v403_v49 = vsub.f32 %v398_v41, %v402_v43 }
 0x2dd   : > { %v404_v54 = vmul.f32 1.442695, %v403_v49 }
 0x2df   : > { %890 = vpow2.f32 %v404_v54 }
 0x2e2   : > { %v492_v44 = vld [vmem:[#allocation2] sm:$0xff] }
 0x2e3   : > { %v495_v45 = vpop.xlane.xlu0 %494  ;;  %523 = vrot.lane.b32.xlu1 %v992_v0, %s943_s8 }
 0x2e4   : > { %v496_v46 = vmax.f32 %v492_v44, %v495_v45  ;;  %877 = vset.pattern.permute.xlu1 %v929_v2 }
 0x2e5   : > { %v891_v56 = vpop.eup %890 }
 0x2e6   : > { %v497_v47 = vsub.f32 %v492_v44, %v496_v46  ;;  %556 = vst.msk [vmem:[#allocation2] sm:$0xff] %vm514_vm6, %v496_v46  ;;  %502 = vperm.xlu0 %875, %v496_v46  }
 0x2e8   : > { %v498_v59 = vmul.f32 1.442695, %v497_v47 }
 0x2ea   : > { %v589_v50 = vpop.xlane.xlu2 %588  ;;  %892 = vpow2.f32 %v498_v59 }
 0x2eb   : > { %617 = vrot.lane.b32.xlu1 %v992_v0, %s944_s9 }
 0x2ed   : > { %v586_v51 = vld [vmem:[#allocation2] sm:$0xff] }
 0x2ee   : > { %v590_v52 = vmax.f32 %v586_v51, %v589_v50  ;;  %882 = vset.pattern.permute.xlu0 %v940_v38 }
 0x2f0   : > { %v591_v53 = vsub.f32 %v586_v51, %v590_v52  ;;  %650 = vst.msk [vmem:[#allocation2] sm:$0xff] %vm608_vm7, %v590_v52  ;;  %596 = vperm.xlu2 %876, %v590_v52   ;;  %v1067_v61 = vpop.eup %892 }
 0x2f2   : > { %v430_v58 = vpop.permute.xlu2 %429  ;;  %v592_v60 = vmul.f32 1.442695, %v591_v53 }
 0x2f3   : > { %336 = vperm.xlu1 %877, %v889_v55   ;;  %450 = vmatpush.msra.mxu3 %v430_v58 }
 0x2f4   : > { %894 = vpow2.f32 %v592_v60 }
 0x2f8   : > { %879 = vset.pattern.permute.xlu2 %v941_v39 }
 0x2fa   : > { %v1070_v62 = vpop.eup %894 }
 0x2fb   : > { %878 = vset.pattern.permute.xlu1 %v940_v38 }
 0x2fc   : > { %425 = vperm.xlu1 %878, %v891_v56  }
 0x319   : > { %328 = vadd.xlane.f32.xlu2 %v327_v57 }
 0x331   : > { %519 = vperm.xlu2 %879, %v1067_v61  }
 0x339   : > { %880 = vset.pattern.permute.xlu2 %v942_v40 }
 0x33a   : > { %613 = vperm.xlu2 %880, %v1070_v62  }
 0x342   : > { %881 = vset.pattern.permute.xlu2 %v929_v2 }
 0x34a   : > { %v597_v63 = vpop.permute.xlu2 %596 }
 0x34b   : > { %v599_v3 = vsub.f32 %v1048_v36, %v597_v63 }
 0x34d   : > { %v409_v0 = vpop.permute.xlu1 %408  ;;  %v600_v5 = vmul.f32 1.442695, %v599_v3 }
 0x34e   : > { %v411_v1 = vsub.f32 %v1036_v29, %v409_v0 }
 0x350   : > { %v412_v4 = vmul.f32 1.442695, %v411_v1 }
 0x352   : > { %896 = vpow2.f32 %v412_v4 }
 0x353   : > { %898 = vpow2.f32 %v600_v5 }
 0x355   : > { %v524_v6 = vpop.permute.xlu1 %523 }
 0x356   : > { %544 = vmatpush.msrb.mxu3 %v524_v6 }
 0x358   : > { %v897_v7 = vpop.eup %896  ;;  %v503_v8 = vpop.permute.xlu0 %502 }
 0x359   : > { %v505_v9 = vsub.f32 %v1043_v33, %v503_v8  ;;  %819 = vmatmul.msk.f32.vlgmr.msra.gmra.mxu3 %vm277_vm1, %v897_v7  ;;  %v416_v2 = vsel %vm277_vm1, %v897_v7, 0.0  ;;  %v899_v12 = vpop.eup %898 }
 0x35a   : > { %417 = vadd.xlane.f32.xlu0 %v416_v2  ;;  %v604_v13 = vsel %vm277_vm1, %v899_v12, 0.0 }
 0x35b   : > { %v506_v10 = vmul.f32 1.442695, %v505_v9 }
 0x35d   : > { %900 = vpow2.f32 %v506_v10  ;;  %v618_v11 = vpop.permute.xlu1 %617 }
 0x35e   : > { %638 = vmatpush.msrb.mxu2 %v618_v11 }
 0x35f   : > { %825 = vmatmul.msk.f32.vlgmr.msrb.gmra.mxu2 %vm277_vm1, %v899_v12 }
 0x362   : > { %605 = vadd.xlane.f32.xlu0 %v604_v13 }
 0x363   : > { %v901_v14 = vpop.eup %900 }
 0x364   : > { %822 = vmatmul.msk.f32.vlgmr.msrb.gmra.mxu3 %vm277_vm1, %v901_v14  ;;  %v510_v29 = vsel %vm277_vm1, %v901_v14, 0.0 }
 0x365   : > { %v337_v16 = vpop.permute.xlu1 %336 }
 0x366   : > { %v339_v17 = vmul.f32 %v337_v16, %v333_v15 }
 0x368   : > { %v366_v18 = vadd.f32 %v1040_v31, %v339_v17 }
 0x36a   : > { %367 = vst.msk [vmem:[#allocation4] sm:$0xff] %vm277_vm1, %v366_v18 }
 0x36e   : > { %v426_v31 = vpop.permute.xlu1 %425 }
 0x371   : > { %v422_v32 = vld [vmem:[#allocation4] sm:$0xff] }
 0x372   : > { %v428_v33 = vmul.f32 %v426_v31, %v422_v32 }
 0x38c   : > { %v329_v21 = vpop.xlane.xlu2 %328 }
 0x38d   : > { %v330_v22 = vadd.f32 %v329_v21, %v326_v20 }
 0x38f   : > { %332 = vst.msk [vmem:[#allocation3] sm:$0xff] %vm331_vm4, %v330_v22 }
 0x394   : > { %v520_v37 = vpop.permute.xlu2 %519 }
 0x396   : > { %v414_v23 = vld [vmem:[#allocation3] sm:$0xff] }
 0x397   : > { %v415_v24 = vmul.f32 %v891_v56, %v414_v23 }
 0x39c   : > { %v614_v52 = vpop.permute.xlu2 %613 }
 0x3cd   : > { %v418_v25 = vpop.xlane.xlu0 %417 }
 0x3ce   : > { %v419_v26 = vadd.f32 %v418_v25, %v415_v24 }
 0x3d0   : > { %421 = vst.msk [vmem:[#allocation3] sm:$0xff] %vm420_vm5, %v419_v26 }
 0x3d5   : > { %v606_v36 = vpop.xlane.xlu0 %605 }
 0x3d7   : > { %v508_v44 = vld [vmem:[#allocation3] sm:$0xff] }
 0x3d8   : > { %v509_v45 = vmul.f32 %v1067_v61, %v508_v44 }
 0x3dc   : > { %v452_v27 = vpop.f32.mrf.mxu3 }
 0x3dd   : > { %456 = vrot.lane.b32.xlu1 %v452_v27, %s945_s10 }
 0x3e2   : > { %v640_v30 = vpop.f32.mrf.mxu2 }
 0x3e7   : > { %v546_v28 = vpop.f32.mrf.mxu3 }
 0x3e8   : > { %550 = vrot.lane.b32.xlu0 %v546_v28, %s946_s11 }
 0x407   : > { %511 = vadd.xlane.f32.xlu1 %v510_v29 }
 0x420   : > { %644 = vrot.lane.b32.xlu1 %v640_v30, %s947_s12 }
 0x44f   : > { %v457_v34 = vpop.permute.xlu1 %456 }
 0x450   : > { %v459_v35 = vadd.f32 %v457_v34, %v428_v33 }
 0x452   : > { %461 = vst.msk [vmem:[#allocation4] sm:$0xff] %vm460_vm9, %v459_v35 }
 0x459   : > { %v516_v38 = vld [vmem:[#allocation4] sm:$0xff] }
 0x45a   : > { %v551_v41 = vpop.permute.xlu0 %550  ;;  %v522_v42 = vmul.f32 %v520_v37, %v516_v38 }
 0x45c   : > { %v553_v43 = vadd.f32 %v551_v41, %v522_v42 }
 0x45e   : > { %555 = vst.msk [vmem:[#allocation4] sm:$0xff] %vm554_vm10, %v553_v43 }
 0x465   : > { %v610_v51 = vld [vmem:[#allocation4] sm:$0xff] }
 0x466   : > { %v616_v54 = vmul.f32 %v614_v52, %v610_v51 }
 0x47a   : > { %v512_v46 = vpop.xlane.xlu1 %511 }
 0x47b   : > { %v513_v47 = vadd.f32 %v512_v46, %v509_v45 }
 0x47d   : > { %515 = vst.msk [vmem:[#allocation3] sm:$0xff] %vm514_vm6, %v513_v47 }
 0x484   : > { %v602_v48 = vld [vmem:[#allocation3] sm:$0xff] }
 0x485   : > { %v603_v49 = vmul.f32 %v1070_v62, %v602_v48 }
 0x487   : > { %v607_v50 = vadd.f32 %v606_v36, %v603_v49 }
 0x489   : > { %609 = vst.msk [vmem:[#allocation3] sm:$0xff] %vm608_vm7, %v607_v50 }
 0x490   : > { %v654_v53 = vld [vmem:[#allocation3] sm:$0xff] }
 0x491   : > { %902 = vrcp.f32 %v654_v53  ;;  %v666_v60 = vand.u32 2147483648, %v654_v53  ;;  %v664_v63 = vand.u32 2147483647, %v654_v53  ;;  %vm660_vm13 = vweird.f32 %v654_v53 }
 0x492   : > { %v645_v55 = vpop.permute.xlu1 %644 }
 0x493   : > { %v647_v56 = vadd.f32 %v645_v55, %v616_v54  ;;  %v667_v0 = vor.u32 1.1754944e-38, %v666_v60  ;;  %vm665_vm15 = vcmp.eq.f32.partialorder %v664_v63, 8.507059e+37 }
 0x495   : > { %649 = vst.msk [vmem:[#allocation4] sm:$0xff] %vm648_vm11, %v647_v56 }
 0x497   : > { %v903_v57 = vpop.eup %902 }
 0x498   : > { %v656_v58 = vmul.f32 %v903_v57, %v654_v53  ;;  %vm661_vm12 = vweird.f32 %v903_v57 }
 0x499   : > { %vm662_vm14 = vmor %vm660_vm13, %vm661_vm12 }
 0x49a   : > { %v657_v59 = vsub.f32 1.0, %v656_v58 }
 0x49c   : > { %v658_v61 = vmul.f32 %v903_v57, %v657_v59  ;;  %v669_v6 = vld [vmem:[#allocation4] sm:$0xff] }
 0x49e   : > { %v659_v62 = vadd.f32 %v903_v57, %v658_v61 }
 0x4a0   : > { %v663_v1 = vsel %vm662_vm14, %v903_v57, %v659_v62 }
 0x4a1   : > { %v668_v3 = vsel %vm665_vm15, %v667_v0, %v663_v1 }
 0x4a2   : > { %677 = vperm.xlu0 %882, %v668_v3   ;;  %672 = vperm.xlu2 %881, %v668_v3  }
 0x4aa   : > { %883 = vset.pattern.permute.xlu2 %v941_v39  ;;  %885 = vset.pattern.permute.xlu0 %v942_v40 }
 0x4ab   : > { %682 = vperm.xlu2 %883, %v668_v3  }
 0x4b3   : > { %884 = vset.pattern.permute.xlu2 %v942_v40 }
 0x4b4   : > { %687 = vperm.xlu2 %884, %v668_v3  }
 0x4fc   : > { %v673_v4 = vpop.permute.xlu2 %672 }
 0x4fd   : > { %v675_v9 = vmul.f32 %v673_v4, %v669_v6 }
 0x505   : > { %v683_v5 = vpop.permute.xlu2 %682 }
 0x506   : > { %v685_v10 = vmul.f32 %v683_v5, %v669_v6 }
 0x50e   : > { %v688_v7 = vpop.permute.xlu2 %687 }
 0x50f   : > { %v690_v11 = vmul.f32 %v688_v7, %v669_v6 }
 0x514   : > { %v678_v8 = vpop.permute.xlu0 %677 }
 0x515   : > { %v680_v2 = vmul.f32 %v678_v8, %v669_v6 }
 0x517   : > { %v691_v39 = vsel %vm277_vm1, %v675_v9, %v680_v2 }
 0x518   : > { %v693_v12 = vsel %vm692_vm0, %v691_v39, %v685_v10 }
 0x519   : > { %v695_v40 = vsel %vm694_vm2, %v693_v12, %v690_v11 }
 0x51a   : > { %697 = vst.msk [vmem:[%s259_s19] sm:$0xff] %vm267_vm8, %v695_v40 }
 0x51b PF: > { %s13_s14 = sadd.s32 1, %s926_s14   ;;  %s1116_s12 = smov %s922_s13 }
 0x51c   : > { %p10_p5 = scmp.ge.s32.totalorder %s13_s14, 4   ;;  %s1117_s13 = smov %s1119_s15 }
 0x51e   :  { %12 = sbr.rel (!%p10_p5) target bundleno = 2 (0x2), region = 76 }

// kernel: encoder_layer.7
= control target key start
LH: loop header
LB: loop body
LE: loop exit
PB: predicated region body
PF: predicated region fallthrough
CT: control target
= control target key end

     0   :  { %vm31_vm0 = vcmask 261120   ;;  %s410_s0 = inlined_call_operand.vmem [shape: f32[16,32], index: 0, kind: input, shape index: {}]   ;;  %s411_s1 = inlined_call_operand.vmem [shape: f32[1,32], index: 1, kind: input, shape index: {}]   ;;  %s412_s2 = inlined_call_operand.vmem [shape: f32[1,32], index: 2, kind: input, shape index: {}]   ;;  %s413_s3 = inlined_call_operand.vmem [shape: f32[32,64], index: 3, kind: input, shape index: {}]   ;;  %s414_s4 = inlined_call_operand.vmem [shape: f32[1,64], index: 4, kind: input, shape index: {}]   ;;  %s415_s5 = inlined_call_operand.vmem [shape: f32[64,32], index: 5, kind: input, shape index: {}]   ;;  %s416_s6 = inlined_call_operand.vmem [shape: f32[1,32], index: 6, kind: input, shape index: {}]   ;;  %s417_s7 = inlined_call_operand.hbm [shape: f32[16,32], index: 7, kind: output, shape index: {}]  }
   0x1   :  { %v327_v0 = vld [vmem:[%s410_s0 + $0x8] sm:$0xff] }
   0x2   :  { %v41_v1 = vsel %vm31_vm0, %v327_v0, 0.0 }
   0x3   :  { %42 = vadd.xlane.f32.xlu0 %v41_v1 }
   0x4   :  { %12 = vsyncpa [#allocation5], 0  ;;  %v334_v2 = vld [vmem:[%s410_s0] sm:$0xff]  ;;  %v279_v4 = vmov 32.0   ;;  %v106_v21 = vld [vmem:[%s413_s3 + $0x18] sm:$0xff]  ;;  %v280_v63 = vmov 0.0  }
   0x5   :  { %v38_v3 = vsel %vm31_vm0, %v334_v2, 0.0  ;;  %247 = vrcp.f32 %v279_v4  ;;  %226 = vmatpush.msra.mxu3 %v106_v21  ;;  %130 = vmatpush.msra.mxu0 %v106_v21  ;;  %v105_v22 = vld [vmem:[%s413_s3 + $0x10] sm:$0xff]  ;;  %v104_v25 = vld [vmem:[%s413_s3 + $0x8] sm:$0xff]  ;;  %v103_v27 = vld [vmem:[%s413_s3] sm:$0xff]  ;;  %32 = vst.msk [vmem:[#allocation2] sm:$0xff] %vm31_vm0, %v280_v63  ;;  %vm153_vm8 = vcmask 523264  }
   0x6   :  { %v152_v33 = vld [vmem:[%s415_s5 + $0x38] sm:$0xff]  ;;  %v151_v34 = vld [vmem:[%s415_s5 + $0x30] sm:$0xff]  ;;  %v150_v36 = vld [vmem:[%s415_s5 + $0x28] sm:$0xff]  ;;  %33 = vst.msk [vmem:[#allocation2 + $0x8] sm:$0xff] %vm31_vm0, %v280_v63  ;;  %s281_s30 = smov [#allocation4]   ;;  %s210_s11 = sshll.u32 %s417_s7, 4  ;;  %s211_s11 = int_to_ptr.hbm [resolvable:$true] %s210_s11 }
   0x7   :  { %227 = vmatpush.msra.mxu3 %v105_v22  ;;  %131 = vmatpush.msra.mxu0 %v105_v22  ;;  %v149_v38 = vld [vmem:[%s415_s5 + $0x20] sm:$0xff]  ;;  %v148_v41 = vld [vmem:[%s415_s5 + $0x18] sm:$0xff]  ;;  %v147_v60 = vld [vmem:[%s415_s5 + $0x10] sm:$0xff]  ;;  %s208_s8 = sshll.u32 %s281_s30, 4  ;;  %s283_s12 = smov 8   ;;  %s209_s8 = int_to_ptr.vmem [resolvable:$true] %s208_s8 }
   0x8   :  { %230 = vmatpush.msra.mxu2 %v152_v33  ;;  %168 = vmatpush.msra.mxu1 %v152_v33  ;;  %v243_v44 = vld [vmem:[%s411_s1] ss:$0 sm:$0xff]  ;;  %v146_v61 = vld [vmem:[%s415_s5 + $0x8] sm:$0xff] }
   0x9   :  { %228 = vmatpush.msra.mxu3 %v104_v25  ;;  %132 = vmatpush.msra.mxu0 %v104_v25  ;;  %v244_v47 = vld [vmem:[%s412_s2] ss:$0 sm:$0xff] }
   0xa   :  { %231 = vmatpush.msra.mxu2 %v151_v34  ;;  %169 = vmatpush.msra.mxu1 %v151_v34  ;;  %v145_v62 = vld [vmem:[%s415_s5] sm:$0xff] }
   0xb   :  { %39 = vadd.xlane.f32.xlu0 %v38_v3  ;;  %v248_v5 = vpop.eup %247  ;;  %229 = vmatpush.msra.mxu3 %v103_v27  ;;  %v245_v1 = vld [vmem:[%s414_s4] ss:$0 sm:$0xff] }
   0xc   :  { %v45_v6 = vmul.f32 32.0, %v248_v5  ;;  %vm49_vm1 = vweird.f32 %v248_v5  ;;  %133 = vmatpush.msra.mxu0 %v103_v27  ;;  %232 = vmatpush.msra.mxu2 %v150_v36 }
   0xd   :  { %170 = vmatpush.msra.mxu1 %v150_v36 }
   0xe   :  { %v46_v7 = vsub.f32 1.0, %v45_v6  ;;  %233 = vmatpush.msra.mxu2 %v149_v38 }
   0xf   :  { %171 = vmatpush.msra.mxu1 %v149_v38 }
  0x10   :  { %v47_v8 = vmul.f32 %v248_v5, %v46_v7  ;;  %234 = vmatpush.msra.mxu2 %v148_v41 }
  0x11   :  { %172 = vmatpush.msra.mxu1 %v148_v41 }
  0x12   :  { %v48_v9 = vadd.f32 %v248_v5, %v47_v8  ;;  %235 = vmatpush.msra.mxu2 %v147_v60 }
  0x13   :  { %173 = vmatpush.msra.mxu1 %v147_v60 }
  0x14   :  { %v50_v10 = vsel %vm49_vm1, %v248_v5, %v48_v9  ;;  %236 = vmatpush.msra.mxu2 %v146_v61  ;;  %v143_v9 = vld [vmem:[#allocation2] sm:$0xff] }
  0x15   :  { %174 = vmatpush.msra.mxu1 %v146_v61 }
  0x16   :  { %237 = vmatpush.msra.mxu2 %v145_v62 }
  0x17   :  { %175 = vmatpush.msra.mxu1 %v145_v62 }
  0x76   :  { %v43_v11 = vpop.xlane.xlu0 %42 }
  0x77   :  { %v52_v12 = vmul.f32 %v50_v10, %v43_v11 }
  0x79   :  { %v54_v13 = vsub.f32 %v327_v0, %v52_v12  ;;  %v144_v12 = vld [vmem:[#allocation2 + $0x8] sm:$0xff] }
  0x7b   :  { %v56_v14 = vmul.f32 %v54_v13, %v54_v13 }
  0x7d   :  { %v60_v15 = vsel %vm31_vm0, %v56_v14, 0.0 }
  0x7e   :  { %61 = vadd.xlane.f32.xlu1 %v60_v15  ;;  %v40_v16 = vpop.xlane.xlu0 %39  ;;  %v246_v15 = vld [vmem:[%s416_s6] ss:$0 sm:$0xff]  ;;  %s282_s6 = smov 128  }
  0x7f   :  { %v51_v17 = vmul.f32 %v50_v10, %v40_v16 }
  0x81   :  { %v341_v18 = vsub.f32 %v334_v2, %v51_v17 }
  0x83   :  { %v55_v19 = vmul.f32 %v341_v18, %v341_v18 }
  0x85   :  { %v57_v20 = vsel %vm31_vm0, %v55_v19, 0.0 }
  0x86   :  { %58 = vadd.xlane.f32.xlu1 %v57_v20 }
  0xf1   :  { %v62_v23 = vpop.xlane.xlu1 %61 }
  0xf2   :  { %v64_v24 = vmul.f32 %v62_v23, %v50_v10 }
  0xf4   :  { %v66_v26 = vadd.f32 1e-05, %v64_v24 }
  0xf6   :  { %249 = vrsqrt.f32 %v66_v26  ;;  %vm83_vm3 = vweird.f32 %v66_v26 }
  0xf9   :  { %v59_v28 = vpop.xlane.xlu1 %58 }
  0xfa   :  { %v63_v29 = vmul.f32 %v59_v28, %v50_v10 }
  0xfc   :  { %v250_v30 = vpop.eup %249  ;;  %v65_v31 = vadd.f32 1e-05, %v63_v29 }
  0xfd   :  { %v78_v32 = vmul.f32 %v250_v30, %v66_v26  ;;  %vm84_vm2 = vweird.f32 %v250_v30 }
  0xfe   :  { %251 = vrsqrt.f32 %v65_v31  ;;  %vm85_vm4 = vmor %vm83_vm3, %vm84_vm2  ;;  %vm73_vm6 = vweird.f32 %v65_v31 }
  0xff   :  { %v79_v35 = vmul.f32 %v250_v30, %v78_v32 }
 0x101   :  { %v80_v37 = vmul.f32 0.5, %v79_v35 }
 0x103   :  { %v81_v39 = vsub.f32 1.5, %v80_v37 }
 0x104   :  { %v252_v40 = vpop.eup %251 }
 0x105   :  { %v82_v42 = vmul.f32 %v250_v30, %v81_v39  ;;  %v68_v43 = vmul.f32 %v252_v40, %v65_v31  ;;  %vm74_vm5 = vweird.f32 %v252_v40 }
 0x106   :  { %vm75_vm7 = vmor %vm73_vm6, %vm74_vm5 }
 0x107   :  { %v86_v45 = vsel %vm85_vm4, %v250_v30, %v82_v42  ;;  %v69_v46 = vmul.f32 %v252_v40, %v68_v43 }
 0x108   :  { %v88_v48 = vmul.f32 %v86_v45, %v54_v13 }
 0x109   :  { %v70_v49 = vmul.f32 0.5, %v69_v46 }
 0x10a   :  { %v93_v50 = vmul.f32 %v243_v44, %v88_v48 }
 0x10b   :  { %v71_v51 = vsub.f32 1.5, %v70_v49 }
 0x10c   :  { %v98_v52 = vadd.f32 %v244_v47, %v93_v50 }
 0x10d   :  { %v72_v53 = vmul.f32 %v252_v40, %v71_v51 }
 0x10e   :  { %100 = vst.msk [vmem:[#allocation3 + $0x8] sm:$0xff] %vm31_vm0, %v98_v52 }
 0x10f   :  { %v76_v54 = vsel %vm75_vm7, %v252_v40, %v72_v53 }
 0x110   :  { %v87_v55 = vmul.f32 %v76_v54, %v341_v18 }
 0x112   :  { %v92_v56 = vmul.f32 %v243_v44, %v87_v55 }
 0x114   :  { %v97_v57 = vadd.f32 %v244_v47, %v92_v56 }
 0x115   :  { %v102_v58 = vld [vmem:[#allocation3 + $0x8] sm:$0xff] }
 0x116   :  { %99 = vst.msk [vmem:[#allocation3] sm:$0xff] %vm31_vm0, %v97_v57  ;;  %223 = vmatmul.msk.f32.vlgmr.msra.gmra.mxu3 %vm31_vm0, %v102_v58 }
 0x11d   :  { %v101_v59 = vld [vmem:[#allocation3] sm:$0xff] }
 0x11e   :  { %222 = vmatmul.msk.f32.vlgmr.msra.gmra.mxu0 %vm31_vm0, %v101_v59 }
 0x199   :  { %v138_v3 = vpop.f32.mrf.mxu3 }
 0x19a   :  { %v139_v4 = vadd.f32 %v245_v1, %v138_v3 }
 0x19b   :  { %v135_v5 = vpop.f32.mrf.mxu0 }
 0x19c   :  { %v142_v6 = vmax.f32 %v139_v4, 0.0  ;;  %v136_v7 = vadd.f32 %v245_v1, %v135_v5 }
 0x19e   :  { %v141_v8 = vmax.f32 %v136_v7, 0.0  ;;  %225 = vmatmul.msk.f32.vlgmr.msra.gmra.mxu2 %vm153_vm8, %v142_v6 }
 0x1a0   :  { %224 = vmatmul.msk.f32.vlgmr.msra.gmra.mxu1 %vm153_vm8, %v141_v8 }
 0x21d   :  { %v177_v10 = vpop.f32.mrf.mxu1 }
 0x21e   :  { %v183_v11 = vadd.f32 %v177_v10, %v143_v9 }
 0x220   :  { %185 = vst.msk [vmem:[#allocation2] sm:$0xff] %vm31_vm0, %v183_v11 }
 0x221   :  { %v180_v13 = vpop.f32.mrf.mxu2 }
 0x222   :  { %v184_v14 = vadd.f32 %v180_v13, %v144_v12 }
 0x224   :  { %186 = vst.msk [vmem:[#allocation2 + $0x8] sm:$0xff] %vm31_vm0, %v184_v14 }
 0x227   :  { %v190_v16 = vld [vmem:[#allocation2] sm:$0xff] }
 0x228   :  { %v196_v17 = vadd.f32 %v246_v15, %v190_v16 }
 0x22a   :  { %v200_v18 = vadd.f32 %v196_v17, %v334_v2 }
 0x22b   :  { %v191_v19 = vld [vmem:[#allocation2 + $0x8] sm:$0xff] }
 0x22c   :  { %v197_v20 = vadd.f32 %v246_v15, %v191_v19  ;;  %202 = vst.msk [vmem:[#allocation4] sm:$0xff] %vm31_vm0, %v200_v18 }
 0x22e   :  { %v201_v21 = vadd.f32 %v197_v20, %v327_v0 }
 0x230   :  { %203 = vst.msk [vmem:[#allocation4 + $0x8] sm:$0xff] %vm31_vm0, %v201_v21 }
 0x231   :  { %216 = dma.vmem_to_hbm [thread:$0]  %s209_s8, 256, %s211_s11, [#allocation5], %s282_s6, %s282_s6, %s283_s12  }
 0x232   :  { %277 = dma.done.wait [#allocation5], 256  }
 0x233   :  { %278 = vsyncadd [#allocation5], 4294967040 }
 0x234   :  { %221 = vsyncpa [#allocation5], 1 }

</bundles_post_ra>
